<compile_context>
chip_gen: v7x
topology: tpu7x:2x2x1
jax: 0.10.0
libtpu: 0.0.40
codegen_flags: <defaults>
</compile_context>

<pallas_src>
import functools

import jax
import jax.numpy as jnp
from jax.experimental import pallas as pl
from jax.experimental.pallas import tpu as pltpu


def _round_up(n: int, m: int) -> int:
    return (n + m - 1) // m * m


def lstm_kernel(x_ref, wih_ref, whh_ref, b_ref, wfc_ref, bfc_ref,
                out_ref, xproj_scr, *, T, Bp, Hp, compute_dtype):
    # ---- Hoisted input projection for all timesteps (one big MXU matmul) ----
    # x_ref: (T*Bp, I) [time-major, batch-padded], wih_ref: (I, 4Hp)
    xw = jnp.dot(x_ref[...], wih_ref[...], preferred_element_type=jnp.float32)
    # Bias broadcast hoisted out of the recurrence (done once for all T*Bp rows).
    xproj_scr[...] = xw + b_ref[...]                      # (T*Bp, 4Hp) f32

    h0 = jnp.zeros((Bp, Hp), jnp.float32)
    c0 = jnp.zeros((Bp, Hp), jnp.float32)

    def step(t, carry):
        h, c = carry
        # Per-step precomputed input projection: contiguous, 8-sublane-aligned rows.
        row0 = pl.multiple_of(t * Bp, 8)
        gx = xproj_scr[pl.ds(row0, Bp), :]                # (Bp, 4Hp)
        # Only the recurrent matmul sits on the serialized dependency chain.
        gates = gx + jnp.dot(h.astype(compute_dtype), whh_ref[...],
                             preferred_element_type=jnp.float32)
        # Gate blocks are 128-lane aligned (Hp is a multiple of 128).
        i_g = jax.nn.sigmoid(gates[:, 0 * Hp:1 * Hp])
        f_g = jax.nn.sigmoid(gates[:, 1 * Hp:2 * Hp])
        g_g = jnp.tanh(gates[:, 2 * Hp:3 * Hp])
        o_g = jax.nn.sigmoid(gates[:, 3 * Hp:4 * Hp])
        c_new = f_g * c + i_g * g_g
        h_new = o_g * jnp.tanh(c_new)
        return h_new, c_new

    h_fin, _ = jax.lax.fori_loop(0, T, step, (h0, c0), unroll=True)

    # Final FC on the last hidden state.
    out = (jnp.dot(h_fin.astype(compute_dtype), wfc_ref[...],
                   preferred_element_type=jnp.float32) + bfc_ref[...])
    out_ref[...] = out.astype(out_ref.dtype)


def lstm_forward(x, w_ih, w_hh, b_ih, b_hh, w_fc, b_fc, *,
                 compute_dtype=jnp.float32):
    """x: (B, T, I) f32. Weights in PyTorch layout:
       w_ih (4H, I), w_hh (4H, H), b_ih/b_hh (4H,), w_fc (O, H), b_fc (O,).
       Returns (B, O) f32. Set compute_dtype=jnp.bfloat16 for production sizes
       (bf16 MXU operands, f32 accumulation)."""
    B, T, I = x.shape
    H = w_hh.shape[1]
    O = w_fc.shape[0]

    Bp = _round_up(B, 8)      # fill f32 sublanes / MXU M dimension
    Hp = _round_up(H, 128)    # 128-lane-aligned gate blocks

    # Time-major, batch-padded input, flattened for one big input projection.
    x_tm = jnp.transpose(x, (1, 0, 2))                        # (T, B, I)
    x_tm = jnp.pad(x_tm, ((0, 0), (0, Bp - B), (0, 0)))       # (T, Bp, I)
    x_flat = x_tm.reshape(T * Bp, I).astype(compute_dtype)    # (T*Bp, I)

    # Per-gate zero-padding of H -> Hp so gate k occupies columns [k*Hp,(k+1)*Hp).
    # Zero weights/biases keep the padded hidden units identically zero.
    w_ih_g = jnp.pad(w_ih.reshape(4, H, I), ((0, 0), (0, Hp - H), (0, 0)))
    wih_t = jnp.transpose(w_ih_g.reshape(4 * Hp, I)).astype(compute_dtype)   # (I, 4Hp)

    w_hh_g = jnp.pad(w_hh.reshape(4, H, H),
                     ((0, 0), (0, Hp - H), (0, Hp - H)))
    whh_t = jnp.transpose(w_hh_g.reshape(4 * Hp, Hp)).astype(compute_dtype)  # (Hp, 4Hp)

    bias = jnp.pad((b_ih + b_hh).reshape(4, H),
                   ((0, 0), (0, Hp - H))).reshape(1, 4 * Hp)                 # (1, 4Hp) f32

    wfc_t = jnp.transpose(jnp.pad(w_fc, ((0, 0), (0, Hp - H)))
                          ).astype(compute_dtype)                            # (Hp, O)
    bfc = b_fc.reshape(1, O)                                                 # (1, O) f32

    kernel = functools.partial(lstm_kernel, T=T, Bp=Bp, Hp=Hp,
                               compute_dtype=compute_dtype)

    vmem_spec = pl.BlockSpec(memory_space=pltpu.MemorySpace.VMEM)
    out_padded = pl.pallas_call(
        kernel,
        out_shape=jax.ShapeDtypeStruct((Bp, O), jnp.float32),
        in_specs=[vmem_spec] * 6,      # all operands fully VMEM-resident, no grid
        out_specs=vmem_spec,
        scratch_shapes=[
            pltpu.VMEM((T * Bp, 4 * Hp), jnp.float32),   # precomputed input projection
        ],
    )(x_flat, wih_t, whh_t, bias, wfc_t, bfc)

    return out_padded[:B]


def lstm_reference(x, w_ih, w_hh, b_ih, b_hh, w_fc, b_fc):
    """Plain-JAX reference with the PyTorch module's semantics."""
    B, T, I = x.shape
    H = w_hh.shape[1]
    h = jnp.zeros((B, H), jnp.float32)
    c = jnp.zeros((B, H), jnp.float32)
    for t in range(T):
        gates = x[:, t, :] @ w_ih.T + b_ih + h @ w_hh.T + b_hh
        i = jax.nn.sigmoid(gates[:, 0 * H:1 * H])
        f = jax.nn.sigmoid(gates[:, 1 * H:2 * H])
        g = jnp.tanh(gates[:, 2 * H:3 * H])
        o = jax.nn.sigmoid(gates[:, 3 * H:4 * H])
        c = f * c + i * g
        h = o * jnp.tanh(c)
    return h @ w_fc.T + b_fc


if __name__ == "__main__":
    # Small shapes consistent with the module: batch=4, seq=8, input=16,
    # hidden=32, output=8.
    B, T, I, H, O = 4, 8, 16, 32, 8

    key = jax.random.PRNGKey(0)
    ks = jax.random.split(key, 7)
    scale = 1.0 / jnp.sqrt(H)

    x = jax.random.normal(ks[0], (B, T, I), jnp.float32)
    w_ih = jax.random.uniform(ks[1], (4 * H, I), jnp.float32, -scale, scale)
    w_hh = jax.random.uniform(ks[2], (4 * H, H), jnp.float32, -scale, scale)
    b_ih = jax.random.uniform(ks[3], (4 * H,), jnp.float32, -scale, scale)
    b_hh = jax.random.uniform(ks[4], (4 * H,), jnp.float32, -scale, scale)
    w_fc = jax.random.uniform(ks[5], (O, H), jnp.float32, -scale, scale)
    b_fc = jax.random.uniform(ks[6], (O,), jnp.float32, -scale, scale)

    out = lstm_forward(x, w_ih, w_hh, b_ih, b_hh, w_fc, b_fc)
    out = jax.block_until_ready(out)

    ref = lstm_reference(x, w_ih, w_hh, b_ih, b_hh, w_fc, b_fc)
    assert out.shape == (B, O)
    assert jnp.allclose(out, ref, atol=1e-4, rtol=1e-4), "mismatch vs reference"

    print("KERNEL_OK")
</pallas_src>

<mosaic_0001>
module attributes {stable_mosaic.version = 11 : i64} {
  func.func @lstm_kernel(%arg0: memref<64x16xf32, #tpu.memory_space<vmem>>, %arg1: memref<16x512xf32, #tpu.memory_space<vmem>>, %arg2: memref<128x512xf32, #tpu.memory_space<vmem>>, %arg3: memref<1x512xf32, #tpu.memory_space<vmem>>, %arg4: memref<128x8xf32, #tpu.memory_space<vmem>>, %arg5: memref<1x8xf32, #tpu.memory_space<vmem>>, %arg6: memref<8x8xf32, #tpu.memory_space<vmem>>, %arg7: memref<64x512xf32, #tpu.memory_space<vmem>>) attributes {dimension_semantics = [], scalar_prefetch = 0 : i64, scratch_operands = 1 : i64, tpu.core_type = #tpu.core_type<tc>} {
    %c0 = arith.constant 0 : index
    %c0_0 = arith.constant 0 : index
    %0 = vector.load %arg0[%c0, %c0_0] : memref<64x16xf32, #tpu.memory_space<vmem>>, vector<64x16xf32>
    %c0_1 = arith.constant 0 : index
    %c0_2 = arith.constant 0 : index
    %1 = vector.load %arg1[%c0_1, %c0_2] : memref<16x512xf32, #tpu.memory_space<vmem>>, vector<16x512xf32>
    %cst = arith.constant dense<0.000000e+00> : vector<64x512xf32>
    %2 = tpu.matmul %0, %1, %cst {dimension_numbers = #tpu.dot_dimension_numbers<[1], [0], [0], [1], [0, 0, 1, 1], [], []>} : vector<64x16xf32>, vector<16x512xf32>, vector<64x512xf32> -> vector<64x512xf32>
    %c0_3 = arith.constant 0 : index
    %c0_4 = arith.constant 0 : index
    %3 = vector.load %arg3[%c0_3, %c0_4] : memref<1x512xf32, #tpu.memory_space<vmem>>, vector<1x512xf32>
    %4 = vector.broadcast %3 : vector<1x512xf32> to vector<64x512xf32>
    %5 = arith.addf %2, %4 : vector<64x512xf32>
    %c0_5 = arith.constant 0 : index
    %c0_6 = arith.constant 0 : index
    %6 = vector.load %arg7[%c0_5, %c0_6] : memref<64x512xf32, #tpu.memory_space<vmem>>, vector<64x512xf32>
    tpu.vector_store %arg7[%c0_5, %c0_6], %5 {strides = array<i32>} : memref<64x512xf32, #tpu.memory_space<vmem>>, vector<64x512xf32>,
    %cst_7 = arith.constant 0.000000e+00 : f32
    %7 = vector.broadcast %cst_7 : f32 to vector<8x128xf32>
    %cst_8 = arith.constant 0.000000e+00 : f32
    %8 = vector.broadcast %cst_8 : f32 to vector<8x128xf32>
    %c0_i32 = arith.constant 0 : i32
    %c8_i32 = arith.constant 8 : i32
    %9 = arith.muli %c0_i32, %c8_i32 : i32
    %10 = tpu.assume_multiple %9, 8 : i32
    %11 = arith.index_cast %10 : i32 to index
    %c0_9 = arith.constant 0 : index
    %12 = vector.load %arg7[%11, %c0_9] : memref<64x512xf32, #tpu.memory_space<vmem>>, vector<8x512xf32>
    %c0_10 = arith.constant 0 : index
    %c0_11 = arith.constant 0 : index
    %13 = vector.load %arg2[%c0_10, %c0_11] : memref<128x512xf32, #tpu.memory_space<vmem>>, vector<128x512xf32>
    %cst_12 = arith.constant dense<0.000000e+00> : vector<8x512xf32>
    %14 = tpu.matmul %7, %13, %cst_12 {dimension_numbers = #tpu.dot_dimension_numbers<[1], [0], [0], [1], [0, 0, 1, 1], [], []>} : vector<8x128xf32>, vector<128x512xf32>, vector<8x512xf32> -> vector<8x512xf32>
    %15 = arith.addf %12, %14 : vector<8x512xf32>
    %16 = vector.extract_strided_slice %15 {offsets = [0, 0], sizes = [8, 128], strides = [1, 1]} : vector<8x512xf32> to vector<8x128xf32>
    %17 = arith.negf %16 : vector<8x128xf32>
    %18 = math.exp %17 : vector<8x128xf32>
    %cst_13 = arith.constant 1.000000e+00 : f32
    %19 = vector.broadcast %cst_13 : f32 to vector<8x128xf32>
    %20 = arith.addf %19, %18 : vector<8x128xf32>
    %21 = arith.divf %19, %20 : vector<8x128xf32>
    %22 = vector.extract_strided_slice %15 {offsets = [0, 128], sizes = [8, 128], strides = [1, 1]} : vector<8x512xf32> to vector<8x128xf32>
    %23 = arith.negf %22 : vector<8x128xf32>
    %24 = math.exp %23 : vector<8x128xf32>
    %cst_14 = arith.constant 1.000000e+00 : f32
    %25 = vector.broadcast %cst_14 : f32 to vector<8x128xf32>
    %26 = arith.addf %25, %24 : vector<8x128xf32>
    %27 = arith.divf %25, %26 : vector<8x128xf32>
    %28 = vector.extract_strided_slice %15 {offsets = [0, 256], sizes = [8, 128], strides = [1, 1]} : vector<8x512xf32> to vector<8x128xf32>
    %29 = math.tanh %28 : vector<8x128xf32>
    %30 = vector.extract_strided_slice %15 {offsets = [0, 384], sizes = [8, 128], strides = [1, 1]} : vector<8x512xf32> to vector<8x128xf32>
    %31 = arith.negf %30 : vector<8x128xf32>
    %32 = math.exp %31 : vector<8x128xf32>
    %cst_15 = arith.constant 1.000000e+00 : f32
    %33 = vector.broadcast %cst_15 : f32 to vector<8x128xf32>
    %34 = arith.addf %33, %32 : vector<8x128xf32>
    %35 = arith.divf %33, %34 : vector<8x128xf32>
    %36 = arith.mulf %27, %8 : vector<8x128xf32>
    %37 = arith.mulf %21, %29 : vector<8x128xf32>
    %38 = arith.addf %36, %37 : vector<8x128xf32>
    %39 = math.tanh %38 : vector<8x128xf32>
    %40 = arith.mulf %35, %39 : vector<8x128xf32>
    %c1_i32 = arith.constant 1 : i32
    %c8_i32_16 = arith.constant 8 : i32
    %41 = arith.muli %c1_i32, %c8_i32_16 : i32
    %42 = tpu.assume_multiple %41, 8 : i32
    %43 = arith.index_cast %42 : i32 to index
    %c0_17 = arith.constant 0 : index
    %44 = vector.load %arg7[%43, %c0_17] : memref<64x512xf32, #tpu.memory_space<vmem>>, vector<8x512xf32>
    %c0_18 = arith.constant 0 : index
    %c0_19 = arith.constant 0 : index
    %45 = vector.load %arg2[%c0_18, %c0_19] : memref<128x512xf32, #tpu.memory_space<vmem>>, vector<128x512xf32>
    %cst_20 = arith.constant dense<0.000000e+00> : vector<8x512xf32>
    %46 = tpu.matmul %40, %45, %cst_20 {dimension_numbers = #tpu.dot_dimension_numbers<[1], [0], [0], [1], [0, 0, 1, 1], [], []>} : vector<8x128xf32>, vector<128x512xf32>, vector<8x512xf32> -> vector<8x512xf32>
    %47 = arith.addf %44, %46 : vector<8x512xf32>
    %48 = vector.extract_strided_slice %47 {offsets = [0, 0], sizes = [8, 128], strides = [1, 1]} : vector<8x512xf32> to vector<8x128xf32>
    %49 = arith.negf %48 : vector<8x128xf32>
    %50 = math.exp %49 : vector<8x128xf32>
    %cst_21 = arith.constant 1.000000e+00 : f32
    %51 = vector.broadcast %cst_21 : f32 to vector<8x128xf32>
    %52 = arith.addf %51, %50 : vector<8x128xf32>
    %53 = arith.divf %51, %52 : vector<8x128xf32>
    %54 = vector.extract_strided_slice %47 {offsets = [0, 128], sizes = [8, 128], strides = [1, 1]} : vector<8x512xf32> to vector<8x128xf32>
    %55 = arith.negf %54 : vector<8x128xf32>
    %56 = math.exp %55 : vector<8x128xf32>
    %cst_22 = arith.constant 1.000000e+00 : f32
    %57 = vector.broadcast %cst_22 : f32 to vector<8x128xf32>
    %58 = arith.addf %57, %56 : vector<8x128xf32>
    %59 = arith.divf %57, %58 : vector<8x128xf32>
    %60 = vector.extract_strided_slice %47 {offsets = [0, 256], sizes = [8, 128], strides = [1, 1]} : vector<8x512xf32> to vector<8x128xf32>
    %61 = math.tanh %60 : vector<8x128xf32>
    %62 = vector.extract_strided_slice %47 {offsets = [0, 384], sizes = [8, 128], strides = [1, 1]} : vector<8x512xf32> to vector<8x128xf32>
    %63 = arith.negf %62 : vector<8x128xf32>
    %64 = math.exp %63 : vector<8x128xf32>
    %cst_23 = arith.constant 1.000000e+00 : f32
    %65 = vector.broadcast %cst_23 : f32 to vector<8x128xf32>
    %66 = arith.addf %65, %64 : vector<8x128xf32>
    %67 = arith.divf %65, %66 : vector<8x128xf32>
    %68 = arith.mulf %59, %38 : vector<8x128xf32>
    %69 = arith.mulf %53, %61 : vector<8x128xf32>
    %70 = arith.addf %68, %69 : vector<8x128xf32>
    %71 = math.tanh %70 : vector<8x128xf32>
    %72 = arith.mulf %67, %71 : vector<8x128xf32>
    %c2_i32 = arith.constant 2 : i32
    %c8_i32_24 = arith.constant 8 : i32
    %73 = arith.muli %c2_i32, %c8_i32_24 : i32
    %74 = tpu.assume_multiple %73, 8 : i32
    %75 = arith.index_cast %74 : i32 to index
    %c0_25 = arith.constant 0 : index
    %76 = vector.load %arg7[%75, %c0_25] : memref<64x512xf32, #tpu.memory_space<vmem>>, vector<8x512xf32>
    %c0_26 = arith.constant 0 : index
    %c0_27 = arith.constant 0 : index
    %77 = vector.load %arg2[%c0_26, %c0_27] : memref<128x512xf32, #tpu.memory_space<vmem>>, vector<128x512xf32>
    %cst_28 = arith.constant dense<0.000000e+00> : vector<8x512xf32>
    %78 = tpu.matmul %72, %77, %cst_28 {dimension_numbers = #tpu.dot_dimension_numbers<[1], [0], [0], [1], [0, 0, 1, 1], [], []>} : vector<8x128xf32>, vector<128x512xf32>, vector<8x512xf32> -> vector<8x512xf32>
    %79 = arith.addf %76, %78 : vector<8x512xf32>
    %80 = vector.extract_strided_slice %79 {offsets = [0, 0], sizes = [8, 128], strides = [1, 1]} : vector<8x512xf32> to vector<8x128xf32>
    %81 = arith.negf %80 : vector<8x128xf32>
    %82 = math.exp %81 : vector<8x128xf32>
    %cst_29 = arith.constant 1.000000e+00 : f32
    %83 = vector.broadcast %cst_29 : f32 to vector<8x128xf32>
    %84 = arith.addf %83, %82 : vector<8x128xf32>
    %85 = arith.divf %83, %84 : vector<8x128xf32>
    %86 = vector.extract_strided_slice %79 {offsets = [0, 128], sizes = [8, 128], strides = [1, 1]} : vector<8x512xf32> to vector<8x128xf32>
    %87 = arith.negf %86 : vector<8x128xf32>
    %88 = math.exp %87 : vector<8x128xf32>
    %cst_30 = arith.constant 1.000000e+00 : f32
    %89 = vector.broadcast %cst_30 : f32 to vector<8x128xf32>
    %90 = arith.addf %89, %88 : vector<8x128xf32>
    %91 = arith.divf %89, %90 : vector<8x128xf32>
    %92 = vector.extract_strided_slice %79 {offsets = [0, 256], sizes = [8, 128], strides = [1, 1]} : vector<8x512xf32> to vector<8x128xf32>
    %93 = math.tanh %92 : vector<8x128xf32>
    %94 = vector.extract_strided_slice %79 {offsets = [0, 384], sizes = [8, 128], strides = [1, 1]} : vector<8x512xf32> to vector<8x128xf32>
    %95 = arith.negf %94 : vector<8x128xf32>
    %96 = math.exp %95 : vector<8x128xf32>
    %cst_31 = arith.constant 1.000000e+00 : f32
    %97 = vector.broadcast %cst_31 : f32 to vector<8x128xf32>
    %98 = arith.addf %97, %96 : vector<8x128xf32>
    %99 = arith.divf %97, %98 : vector<8x128xf32>
    %100 = arith.mulf %91, %70 : vector<8x128xf32>
    %101 = arith.mulf %85, %93 : vector<8x128xf32>
    %102 = arith.addf %100, %101 : vector<8x128xf32>
    %103 = math.tanh %102 : vector<8x128xf32>
    %104 = arith.mulf %99, %103 : vector<8x128xf32>
    %c3_i32 = arith.constant 3 : i32
    %c8_i32_32 = arith.constant 8 : i32
    %105 = arith.muli %c3_i32, %c8_i32_32 : i32
    %106 = tpu.assume_multiple %105, 8 : i32
    %107 = arith.index_cast %106 : i32 to index
    %c0_33 = arith.constant 0 : index
    %108 = vector.load %arg7[%107, %c0_33] : memref<64x512xf32, #tpu.memory_space<vmem>>, vector<8x512xf32>
    %c0_34 = arith.constant 0 : index
    %c0_35 = arith.constant 0 : index
    %109 = vector.load %arg2[%c0_34, %c0_35] : memref<128x512xf32, #tpu.memory_space<vmem>>, vector<128x512xf32>
    %cst_36 = arith.constant dense<0.000000e+00> : vector<8x512xf32>
    %110 = tpu.matmul %104, %109, %cst_36 {dimension_numbers = #tpu.dot_dimension_numbers<[1], [0], [0], [1], [0, 0, 1, 1], [], []>} : vector<8x128xf32>, vector<128x512xf32>, vector<8x512xf32> -> vector<8x512xf32>
    %111 = arith.addf %108, %110 : vector<8x512xf32>
    %112 = vector.extract_strided_slice %111 {offsets = [0, 0], sizes = [8, 128], strides = [1, 1]} : vector<8x512xf32> to vector<8x128xf32>
    %113 = arith.negf %112 : vector<8x128xf32>
    %114 = math.exp %113 : vector<8x128xf32>
    %cst_37 = arith.constant 1.000000e+00 : f32
    %115 = vector.broadcast %cst_37 : f32 to vector<8x128xf32>
    %116 = arith.addf %115, %114 : vector<8x128xf32>
    %117 = arith.divf %115, %116 : vector<8x128xf32>
    %118 = vector.extract_strided_slice %111 {offsets = [0, 128], sizes = [8, 128], strides = [1, 1]} : vector<8x512xf32> to vector<8x128xf32>
    %119 = arith.negf %118 : vector<8x128xf32>
    %120 = math.exp %119 : vector<8x128xf32>
    %cst_38 = arith.constant 1.000000e+00 : f32
    %121 = vector.broadcast %cst_38 : f32 to vector<8x128xf32>
    %122 = arith.addf %121, %120 : vector<8x128xf32>
    %123 = arith.divf %121, %122 : vector<8x128xf32>
    %124 = vector.extract_strided_slice %111 {offsets = [0, 256], sizes = [8, 128], strides = [1, 1]} : vector<8x512xf32> to vector<8x128xf32>
    %125 = math.tanh %124 : vector<8x128xf32>
    %126 = vector.extract_strided_slice %111 {offsets = [0, 384], sizes = [8, 128], strides = [1, 1]} : vector<8x512xf32> to vector<8x128xf32>
    %127 = arith.negf %126 : vector<8x128xf32>
    %128 = math.exp %127 : vector<8x128xf32>
    %cst_39 = arith.constant 1.000000e+00 : f32
    %129 = vector.broadcast %cst_39 : f32 to vector<8x128xf32>
    %130 = arith.addf %129, %128 : vector<8x128xf32>
    %131 = arith.divf %129, %130 : vector<8x128xf32>
    %132 = arith.mulf %123, %102 : vector<8x128xf32>
    %133 = arith.mulf %117, %125 : vector<8x128xf32>
    %134 = arith.addf %132, %133 : vector<8x128xf32>
    %135 = math.tanh %134 : vector<8x128xf32>
    %136 = arith.mulf %131, %135 : vector<8x128xf32>
    %c4_i32 = arith.constant 4 : i32
    %c8_i32_40 = arith.constant 8 : i32
    %137 = arith.muli %c4_i32, %c8_i32_40 : i32
    %138 = tpu.assume_multiple %137, 8 : i32
    %139 = arith.index_cast %138 : i32 to index
    %c0_41 = arith.constant 0 : index
    %140 = vector.load %arg7[%139, %c0_41] : memref<64x512xf32, #tpu.memory_space<vmem>>, vector<8x512xf32>
    %c0_42 = arith.constant 0 : index
    %c0_43 = arith.constant 0 : index
    %141 = vector.load %arg2[%c0_42, %c0_43] : memref<128x512xf32, #tpu.memory_space<vmem>>, vector<128x512xf32>
    %cst_44 = arith.constant dense<0.000000e+00> : vector<8x512xf32>
    %142 = tpu.matmul %136, %141, %cst_44 {dimension_numbers = #tpu.dot_dimension_numbers<[1], [0], [0], [1], [0, 0, 1, 1], [], []>} : vector<8x128xf32>, vector<128x512xf32>, vector<8x512xf32> -> vector<8x512xf32>
    %143 = arith.addf %140, %142 : vector<8x512xf32>
    %144 = vector.extract_strided_slice %143 {offsets = [0, 0], sizes = [8, 128], strides = [1, 1]} : vector<8x512xf32> to vector<8x128xf32>
    %145 = arith.negf %144 : vector<8x128xf32>
    %146 = math.exp %145 : vector<8x128xf32>
    %cst_45 = arith.constant 1.000000e+00 : f32
    %147 = vector.broadcast %cst_45 : f32 to vector<8x128xf32>
    %148 = arith.addf %147, %146 : vector<8x128xf32>
    %149 = arith.divf %147, %148 : vector<8x128xf32>
    %150 = vector.extract_strided_slice %143 {offsets = [0, 128], sizes = [8, 128], strides = [1, 1]} : vector<8x512xf32> to vector<8x128xf32>
    %151 = arith.negf %150 : vector<8x128xf32>
    %152 = math.exp %151 : vector<8x128xf32>
    %cst_46 = arith.constant 1.000000e+00 : f32
    %153 = vector.broadcast %cst_46 : f32 to vector<8x128xf32>
    %154 = arith.addf %153, %152 : vector<8x128xf32>
    %155 = arith.divf %153, %154 : vector<8x128xf32>
    %156 = vector.extract_strided_slice %143 {offsets = [0, 256], sizes = [8, 128], strides = [1, 1]} : vector<8x512xf32> to vector<8x128xf32>
    %157 = math.tanh %156 : vector<8x128xf32>
    %158 = vector.extract_strided_slice %143 {offsets = [0, 384], sizes = [8, 128], strides = [1, 1]} : vector<8x512xf32> to vector<8x128xf32>
    %159 = arith.negf %158 : vector<8x128xf32>
    %160 = math.exp %159 : vector<8x128xf32>
    %cst_47 = arith.constant 1.000000e+00 : f32
    %161 = vector.broadcast %cst_47 : f32 to vector<8x128xf32>
    %162 = arith.addf %161, %160 : vector<8x128xf32>
    %163 = arith.divf %161, %162 : vector<8x128xf32>
    %164 = arith.mulf %155, %134 : vector<8x128xf32>
    %165 = arith.mulf %149, %157 : vector<8x128xf32>
    %166 = arith.addf %164, %165 : vector<8x128xf32>
    %167 = math.tanh %166 : vector<8x128xf32>
    %168 = arith.mulf %163, %167 : vector<8x128xf32>
    %c5_i32 = arith.constant 5 : i32
    %c8_i32_48 = arith.constant 8 : i32
    %169 = arith.muli %c5_i32, %c8_i32_48 : i32
    %170 = tpu.assume_multiple %169, 8 : i32
    %171 = arith.index_cast %170 : i32 to index
    %c0_49 = arith.constant 0 : index
    %172 = vector.load %arg7[%171, %c0_49] : memref<64x512xf32, #tpu.memory_space<vmem>>, vector<8x512xf32>
    %c0_50 = arith.constant 0 : index
    %c0_51 = arith.constant 0 : index
    %173 = vector.load %arg2[%c0_50, %c0_51] : memref<128x512xf32, #tpu.memory_space<vmem>>, vector<128x512xf32>
    %cst_52 = arith.constant dense<0.000000e+00> : vector<8x512xf32>
    %174 = tpu.matmul %168, %173, %cst_52 {dimension_numbers = #tpu.dot_dimension_numbers<[1], [0], [0], [1], [0, 0, 1, 1], [], []>} : vector<8x128xf32>, vector<128x512xf32>, vector<8x512xf32> -> vector<8x512xf32>
    %175 = arith.addf %172, %174 : vector<8x512xf32>
    %176 = vector.extract_strided_slice %175 {offsets = [0, 0], sizes = [8, 128], strides = [1, 1]} : vector<8x512xf32> to vector<8x128xf32>
    %177 = arith.negf %176 : vector<8x128xf32>
    %178 = math.exp %177 : vector<8x128xf32>
    %cst_53 = arith.constant 1.000000e+00 : f32
    %179 = vector.broadcast %cst_53 : f32 to vector<8x128xf32>
    %180 = arith.addf %179, %178 : vector<8x128xf32>
    %181 = arith.divf %179, %180 : vector<8x128xf32>
    %182 = vector.extract_strided_slice %175 {offsets = [0, 128], sizes = [8, 128], strides = [1, 1]} : vector<8x512xf32> to vector<8x128xf32>
    %183 = arith.negf %182 : vector<8x128xf32>
    %184 = math.exp %183 : vector<8x128xf32>
    %cst_54 = arith.constant 1.000000e+00 : f32
    %185 = vector.broadcast %cst_54 : f32 to vector<8x128xf32>
    %186 = arith.addf %185, %184 : vector<8x128xf32>
    %187 = arith.divf %185, %186 : vector<8x128xf32>
    %188 = vector.extract_strided_slice %175 {offsets = [0, 256], sizes = [8, 128], strides = [1, 1]} : vector<8x512xf32> to vector<8x128xf32>
    %189 = math.tanh %188 : vector<8x128xf32>
    %190 = vector.extract_strided_slice %175 {offsets = [0, 384], sizes = [8, 128], strides = [1, 1]} : vector<8x512xf32> to vector<8x128xf32>
    %191 = arith.negf %190 : vector<8x128xf32>
    %192 = math.exp %191 : vector<8x128xf32>
    %cst_55 = arith.constant 1.000000e+00 : f32
    %193 = vector.broadcast %cst_55 : f32 to vector<8x128xf32>
    %194 = arith.addf %193, %192 : vector<8x128xf32>
    %195 = arith.divf %193, %194 : vector<8x128xf32>
    %196 = arith.mulf %187, %166 : vector<8x128xf32>
    %197 = arith.mulf %181, %189 : vector<8x128xf32>
    %198 = arith.addf %196, %197 : vector<8x128xf32>
    %199 = math.tanh %198 : vector<8x128xf32>
    %200 = arith.mulf %195, %199 : vector<8x128xf32>
    %c6_i32 = arith.constant 6 : i32
    %c8_i32_56 = arith.constant 8 : i32
    %201 = arith.muli %c6_i32, %c8_i32_56 : i32
    %202 = tpu.assume_multiple %201, 8 : i32
    %203 = arith.index_cast %202 : i32 to index
    %c0_57 = arith.constant 0 : index
    %204 = vector.load %arg7[%203, %c0_57] : memref<64x512xf32, #tpu.memory_space<vmem>>, vector<8x512xf32>
    %c0_58 = arith.constant 0 : index
    %c0_59 = arith.constant 0 : index
    %205 = vector.load %arg2[%c0_58, %c0_59] : memref<128x512xf32, #tpu.memory_space<vmem>>, vector<128x512xf32>
    %cst_60 = arith.constant dense<0.000000e+00> : vector<8x512xf32>
    %206 = tpu.matmul %200, %205, %cst_60 {dimension_numbers = #tpu.dot_dimension_numbers<[1], [0], [0], [1], [0, 0, 1, 1], [], []>} : vector<8x128xf32>, vector<128x512xf32>, vector<8x512xf32> -> vector<8x512xf32>
    %207 = arith.addf %204, %206 : vector<8x512xf32>
    %208 = vector.extract_strided_slice %207 {offsets = [0, 0], sizes = [8, 128], strides = [1, 1]} : vector<8x512xf32> to vector<8x128xf32>
    %209 = arith.negf %208 : vector<8x128xf32>
    %210 = math.exp %209 : vector<8x128xf32>
    %cst_61 = arith.constant 1.000000e+00 : f32
    %211 = vector.broadcast %cst_61 : f32 to vector<8x128xf32>
    %212 = arith.addf %211, %210 : vector<8x128xf32>
    %213 = arith.divf %211, %212 : vector<8x128xf32>
    %214 = vector.extract_strided_slice %207 {offsets = [0, 128], sizes = [8, 128], strides = [1, 1]} : vector<8x512xf32> to vector<8x128xf32>
    %215 = arith.negf %214 : vector<8x128xf32>
    %216 = math.exp %215 : vector<8x128xf32>
    %cst_62 = arith.constant 1.000000e+00 : f32
    %217 = vector.broadcast %cst_62 : f32 to vector<8x128xf32>
    %218 = arith.addf %217, %216 : vector<8x128xf32>
    %219 = arith.divf %217, %218 : vector<8x128xf32>
    %220 = vector.extract_strided_slice %207 {offsets = [0, 256], sizes = [8, 128], strides = [1, 1]} : vector<8x512xf32> to vector<8x128xf32>
    %221 = math.tanh %220 : vector<8x128xf32>
    %222 = vector.extract_strided_slice %207 {offsets = [0, 384], sizes = [8, 128], strides = [1, 1]} : vector<8x512xf32> to vector<8x128xf32>
    %223 = arith.negf %222 : vector<8x128xf32>
    %224 = math.exp %223 : vector<8x128xf32>
    %cst_63 = arith.constant 1.000000e+00 : f32
    %225 = vector.broadcast %cst_63 : f32 to vector<8x128xf32>
    %226 = arith.addf %225, %224 : vector<8x128xf32>
    %227 = arith.divf %225, %226 : vector<8x128xf32>
    %228 = arith.mulf %219, %198 : vector<8x128xf32>
    %229 = arith.mulf %213, %221 : vector<8x128xf32>
    %230 = arith.addf %228, %229 : vector<8x128xf32>
    %231 = math.tanh %230 : vector<8x128xf32>
    %232 = arith.mulf %227, %231 : vector<8x128xf32>
    %c7_i32 = arith.constant 7 : i32
    %c8_i32_64 = arith.constant 8 : i32
    %233 = arith.muli %c7_i32, %c8_i32_64 : i32
    %234 = tpu.assume_multiple %233, 8 : i32
    %235 = arith.index_cast %234 : i32 to index
    %c0_65 = arith.constant 0 : index
    %236 = vector.load %arg7[%235, %c0_65] : memref<64x512xf32, #tpu.memory_space<vmem>>, vector<8x512xf32>
    %c0_66 = arith.constant 0 : index
    %c0_67 = arith.constant 0 : index
    %237 = vector.load %arg2[%c0_66, %c0_67] : memref<128x512xf32, #tpu.memory_space<vmem>>, vector<128x512xf32>
    %cst_68 = arith.constant dense<0.000000e+00> : vector<8x512xf32>
    %238 = tpu.matmul %232, %237, %cst_68 {dimension_numbers = #tpu.dot_dimension_numbers<[1], [0], [0], [1], [0, 0, 1, 1], [], []>} : vector<8x128xf32>, vector<128x512xf32>, vector<8x512xf32> -> vector<8x512xf32>
    %239 = arith.addf %236, %238 : vector<8x512xf32>
    %240 = vector.extract_strided_slice %239 {offsets = [0, 0], sizes = [8, 128], strides = [1, 1]} : vector<8x512xf32> to vector<8x128xf32>
    %241 = arith.negf %240 : vector<8x128xf32>
    %242 = math.exp %241 : vector<8x128xf32>
    %cst_69 = arith.constant 1.000000e+00 : f32
    %243 = vector.broadcast %cst_69 : f32 to vector<8x128xf32>
    %244 = arith.addf %243, %242 : vector<8x128xf32>
    %245 = arith.divf %243, %244 : vector<8x128xf32>
    %246 = vector.extract_strided_slice %239 {offsets = [0, 128], sizes = [8, 128], strides = [1, 1]} : vector<8x512xf32> to vector<8x128xf32>
    %247 = arith.negf %246 : vector<8x128xf32>
    %248 = math.exp %247 : vector<8x128xf32>
    %cst_70 = arith.constant 1.000000e+00 : f32
    %249 = vector.broadcast %cst_70 : f32 to vector<8x128xf32>
    %250 = arith.addf %249, %248 : vector<8x128xf32>
    %251 = arith.divf %249, %250 : vector<8x128xf32>
    %252 = vector.extract_strided_slice %239 {offsets = [0, 256], sizes = [8, 128], strides = [1, 1]} : vector<8x512xf32> to vector<8x128xf32>
    %253 = math.tanh %252 : vector<8x128xf32>
    %254 = vector.extract_strided_slice %239 {offsets = [0, 384], sizes = [8, 128], strides = [1, 1]} : vector<8x512xf32> to vector<8x128xf32>
    %255 = arith.negf %254 : vector<8x128xf32>
    %256 = math.exp %255 : vector<8x128xf32>
    %cst_71 = arith.constant 1.000000e+00 : f32
    %257 = vector.broadcast %cst_71 : f32 to vector<8x128xf32>
    %258 = arith.addf %257, %256 : vector<8x128xf32>
    %259 = arith.divf %257, %258 : vector<8x128xf32>
    %260 = arith.mulf %251, %230 : vector<8x128xf32>
    %261 = arith.mulf %245, %253 : vector<8x128xf32>
    %262 = arith.addf %260, %261 : vector<8x128xf32>
    %263 = math.tanh %262 : vector<8x128xf32>
    %264 = arith.mulf %259, %263 : vector<8x128xf32>
    %c8_i32_72 = arith.constant 8 : i32
    %c0_73 = arith.constant 0 : index
    %c0_74 = arith.constant 0 : index
    %265 = vector.load %arg4[%c0_73, %c0_74] : memref<128x8xf32, #tpu.memory_space<vmem>>, vector<128x8xf32>
    %cst_75 = arith.constant dense<0.000000e+00> : vector<8x8xf32>
    %266 = tpu.matmul %264, %265, %cst_75 {dimension_numbers = #tpu.dot_dimension_numbers<[1], [0], [0], [1], [0, 0, 1, 1], [], []>} : vector<8x128xf32>, vector<128x8xf32>, vector<8x8xf32> -> vector<8x8xf32>
    %c0_76 = arith.constant 0 : index
    %c0_77 = arith.constant 0 : index
    %267 = vector.load %arg5[%c0_76, %c0_77] : memref<1x8xf32, #tpu.memory_space<vmem>>, vector<1x8xf32>
    %268 = vector.broadcast %267 : vector<1x8xf32> to vector<8x8xf32>
    %269 = arith.addf %266, %268 : vector<8x8xf32>
    %c0_78 = arith.constant 0 : index
    %c0_79 = arith.constant 0 : index
    %270 = vector.load %arg6[%c0_78, %c0_79] : memref<8x8xf32, #tpu.memory_space<vmem>>, vector<8x8xf32>
    tpu.vector_store %arg6[%c0_78, %c0_79], %269 {strides = array<i32>} : memref<8x8xf32, #tpu.memory_space<vmem>>, vector<8x8xf32>,
    return
  }
}

</mosaic_0001>

<bundles_post_ra>
// kernel: tpu_custom_call.1
= control target key start
LH: loop header
LB: loop body
LE: loop exit
PB: predicated region body
PF: predicated region fallthrough
CT: control target
= control target key end

     0   :  { %11 = vsyncpa [#allocation4], 0  ;;  %s3447_s0 = inlined_call_operand.vmem [shape: f32[64,16], index: 0, kind: input, shape index: {}]   ;;  %s3448_s1 = inlined_call_operand.vmem [shape: f32[16,512], index: 1, kind: input, shape index: {}]   ;;  %s3449_s2 = inlined_call_operand.hbm [shape: f32[128,512], index: 2, kind: input, shape index: {}]   ;;  %s3450_s3 = inlined_call_operand.vmem [shape: f32[1,512], index: 3, kind: input, shape index: {}]   ;;  %s3451_s4 = inlined_call_operand.vmem [shape: f32[128,8], index: 4, kind: input, shape index: {}]   ;;  %s3452_s5 = inlined_call_operand.vmem [shape: f32[1,8], index: 5, kind: input, shape index: {}]   ;;  %s3453_s6 = inlined_call_operand.hbm [shape: f32[8,8], index: 6, kind: output, shape index: {}]  }
   0x1   :  { %12 = vsyncpa [#allocation5], 0  ;;  %s2840_s21 = smov [#allocation3]   ;;  %s2792_s25 = scalar_lea.hbm %s3449_s2, 8192 }
   0x2   :  { %s22_s22 = sshll.u32 %s2840_s21, 4  ;;  %p2793_p0 = scmp.ne.s32.totalorder %s3449_s2, %s2792_s25  ;;  %s23_s22 = int_to_ptr.vmem [resolvable:$true] %s22_s22 }
   0x3   :  { %p2796_p1 = scmp.lt.u32.totalorder %s2792_s25, %s3449_s2 }
   0x5   :  { %p2798_p2 = pnand %p2796_p1, %p2793_p0 }
   0x7   :  { %2801 = shalt.err (!%p2798_p2)
}
   0x8   :  { %s2802_s30 = scalar_lea.vmem %s23_s22, 8192  ;;  %p2807_p4 = scmp.lt.s32.totalorder %s23_s22, %s23_s22 }
   0x9   :  { %p2803_p3 = scmp.ne.s32.totalorder %s23_s22, %s2802_s30  ;;  %p2808_p5 = scmp.lt.s32.totalorder %s2802_s30, %s2802_s30 }
   0xb   :  { %p2809_p6 = por %p2808_p5, %p2807_p4 }
   0xd   :  { %p2810_p7 = pnand %p2809_p6, %p2803_p3 }
   0xf   :  { %2813 = shalt.err (!%p2810_p7)
}
  0x10   :  { %s2841_s7 = smov 512   ;;  %s2842_s8 = smov 32  }
  0x11   :  { %28 = dma.hbm_to_vmem [thread:$0]  %s3449_s2, 8192, %s23_s22, [#allocation4], %s2841_s7, %s2841_s7, %s2842_s8  }
  0x12   :  { %2836 = dma.done.wait [#allocation4], 8192  }
  0x13   :  { %2837 = vsyncadd [#allocation4], 4294959104  ;;  %v2843_v0 = vmov 0.0   ;;  %v47_v1 = vld [vmem:[%s3448_s1 + $0x8] sm:$0xff]  ;;  %v49_v3 = vld [vmem:[%s3448_s1 + $0x18] sm:$0xff]  ;;  %vm76_vm0 = vcmask 130048  }
  0x14   :  { %165 = vmatprep.mubr.f32.mxu0 %v2843_v0  ;;  %278 = vmatprep.mubr.f32.mxu1 %v2843_v0  ;;  %v51_v2 = vld [vmem:[%s3448_s1 + $0x28] sm:$0xff]  ;;  %v53_v5 = vld [vmem:[%s3448_s1 + $0x38] sm:$0xff]  ;;  %v46_v6 = vld [vmem:[%s3448_s1] sm:$0xff]  ;;  %vm2845_vm1 = vmmov 0   ;;  %s2846_s21 = smov [#allocation6]   ;;  %vm1932_vm2 = vcmask 64512  }
  0x15   :  { %v2049_v4 = vpack.c.bf16 %v51_v2, %v47_v1  ;;  %v50_v7 = vld [vmem:[%s3448_s1 + $0x20] sm:$0xff]  ;;  %v2053_v8 = vpack.c.bf16 %v53_v5, %v49_v3  ;;  %v48_v10 = vld [vmem:[%s3448_s1 + $0x10] sm:$0xff]  ;;  %v367_v14 = vld [vmem:[#allocation3 + $0x8] sm:$0xff]  ;;  %s1940_s22 = sshll.u32 %s2846_s21, 4  ;;  %s1941_s22 = int_to_ptr.vmem [resolvable:$true] %s1940_s22 }
  0x16   :  { %v2051_v9 = vpack.c.bf16 %v50_v7, %v46_v6  ;;  %v52_v11 = vld [vmem:[%s3448_s1 + $0x30] sm:$0xff]  ;;  %v38_v12 = vld [vmem:[%s3447_s0] sm:$0xff]  ;;  %v371_v15 = vld [vmem:[#allocation3 + $0x28] sm:$0xff]  ;;  %s2814_s23 = scalar_lea.vmem %s1941_s22, 128  ;;  %p2819_p9 = scmp.lt.s32.totalorder %s1941_s22, %s1941_s22 }
  0x17   :  { %2050 = vmatprep.subr.bf16.mxu0 %v2049_v4  ;;  %v2055_v13 = vpack.c.bf16 %v52_v11, %v48_v10  ;;  %v369_v16 = vld [vmem:[#allocation3 + $0x18] sm:$0xff]  ;;  %2054 = vmatprep.subr.bf16.mxu1 %v2053_v8  ;;  %v2923_v17 = vpack.c.bf16 %v371_v15, %v367_v14  ;;  %v366_v19 = vld [vmem:[#allocation3] sm:$0xff]  ;;  %v368_v23 = vld [vmem:[#allocation3 + $0x10] sm:$0xff]  ;;  %p2815_p8 = scmp.ne.s32.totalorder %s1941_s22, %s2814_s23  ;;  %p2820_p10 = scmp.lt.s32.totalorder %s2814_s23, %s2814_s23 }
  0x18   :  { %2052 = vmatpush1.bf16.msra.mxu0 %v2051_v9  ;;  %v373_v18 = vld [vmem:[#allocation3 + $0x38] sm:$0xff]  ;;  %v370_v20 = vld [vmem:[#allocation3 + $0x20] sm:$0xff]  ;;  %v372_v24 = vld [vmem:[#allocation3 + $0x30] sm:$0xff] }
  0x19   :  { %2056 = vmatpush1.bf16.msra.mxu1 %v2055_v13  ;;  %v2925_v21 = vpack.c.bf16 %v373_v18, %v369_v16  ;;  %v2927_v22 = vpack.c.bf16 %v370_v20, %v366_v19  ;;  %2058 = vmatprep.subr.bf16.mxu0 %v2923_v17  ;;  %v2930_v25 = vpack.c.bf16 %v372_v24, %v368_v23  ;;  %v375_v26 = vld [vmem:[#allocation3 + $0x48] sm:$0xff]  ;;  %v377_v28 = vld [vmem:[#allocation3 + $0x58] sm:$0xff]  ;;  %v374_v31 = vld [vmem:[#allocation3 + $0x40] sm:$0xff]  ;;  %p2821_p11 = por %p2820_p10, %p2819_p9 }
  0x1a   :  { %v379_v27 = vld [vmem:[#allocation3 + $0x68] sm:$0xff]  ;;  %v381_v30 = vld [vmem:[#allocation3 + $0x78] sm:$0xff]  ;;  %v378_v32 = vld [vmem:[#allocation3 + $0x60] sm:$0xff] }
  0x1b   :  { %1956 = vmatmul.mubr.msk.f32.vlgmr.msra.gmra.mrb[0].mxu0 %vm76_vm0, %v38_v12  ;;  %2090 = vmatprep.subr.bf16.mxu1 %v2925_v21  ;;  %v2934_v29 = vpack.c.bf16 %v379_v27, %v375_v26  ;;  %v39_v33 = vld [vmem:[%s3447_s0 + $0x8] sm:$0xff]  ;;  %v2941_v34 = vpack.c.bf16 %v381_v30, %v377_v28  ;;  %v2943_v35 = vpack.c.bf16 %v378_v32, %v374_v31  ;;  %v376_v36 = vld [vmem:[#allocation3 + $0x50] sm:$0xff]  ;;  %v385_v41 = vld [vmem:[#allocation3 + $0x98] sm:$0xff]  ;;  %p2822_p12 = pnand %p2821_p11, %p2815_p8 }
  0x1c   :  { %1964 = vmatmul.mubr.msk.f32.vlgmr.msra.gmra.mrb[0].mxu1 %vm76_vm0, %v38_v12  ;;  %2060 = vmatpush1.bf16.msra.mxu0 %v2927_v22  ;;  %v380_v37 = vld [vmem:[#allocation3 + $0x70] sm:$0xff]  ;;  %v383_v39 = vld [vmem:[#allocation3 + $0x88] sm:$0xff]  ;;  %v389_v43 = vld [vmem:[#allocation3 + $0xb8] sm:$0xff] }
  0x1d   :  { %2092 = vmatpush1.bf16.msra.mxu1 %v2930_v25  ;;  %171 = vmatprep.mubr.f32.mxu0 %v2843_v0  ;;  %v2947_v38 = vpack.c.bf16 %v380_v37, %v376_v36  ;;  %v387_v40 = vld [vmem:[#allocation3 + $0xa8] sm:$0xff]  ;;  %v382_v44 = vld [vmem:[#allocation3 + $0x80] sm:$0xff]  ;;  %v40_v46 = vld [vmem:[%s3447_s0 + $0x10] sm:$0xff]  ;;  %v2958_v47 = vpack.c.bf16 %v389_v43, %v385_v41 }
  0x1e   :  { %284 = vmatprep.mubr.f32.mxu1 %v2843_v0  ;;  %2062 = vmatprep.subr.bf16.mxu0 %v2934_v29  ;;  %v2951_v42 = vpack.c.bf16 %v387_v40, %v383_v39  ;;  %v386_v45 = vld [vmem:[#allocation3 + $0xa0] sm:$0xff]  ;;  %v384_v48 = vld [vmem:[#allocation3 + $0x90] sm:$0xff]  ;;  %v391_v51 = vld [vmem:[#allocation3 + $0xc8] sm:$0xff] }
  0x1f   :  { %1957 = vmatmul.mubr.msk.f32.gmra.mrb[2].mxu0 %vm76_vm0, %v39_v33  ;;  %2094 = vmatprep.subr.bf16.mxu1 %v2941_v34  ;;  %v388_v49 = vld [vmem:[#allocation3 + $0xb0] sm:$0xff]  ;;  %v2962_v50 = vpack.c.bf16 %v386_v45, %v382_v44  ;;  %v395_v52 = vld [vmem:[#allocation3 + $0xe8] sm:$0xff]  ;;  %v393_v53 = vld [vmem:[#allocation3 + $0xd8] sm:$0xff] }
  0x20   :  { %1965 = vmatmul.mubr.msk.f32.gmra.mrb[2].mxu1 %vm76_vm0, %v39_v33  ;;  %2064 = vmatpush1.bf16.msra.mxu0 %v2943_v35  ;;  %v2966_v54 = vpack.c.bf16 %v388_v49, %v384_v48  ;;  %v397_v55 = vld [vmem:[#allocation3 + $0xf8] sm:$0xff]  ;;  %v390_v56 = vld [vmem:[#allocation3 + $0xc0] sm:$0xff]  ;;  %v2970_v58 = vpack.c.bf16 %v395_v52, %v391_v51  ;;  %v392_v59 = vld [vmem:[#allocation3 + $0xd0] sm:$0xff] }
  0x21   :  { %2096 = vmatpush1.bf16.msra.mxu1 %v2947_v38  ;;  %177 = vmatprep.mubr.f32.mxu0 %v2843_v0  ;;  %v394_v57 = vld [vmem:[#allocation3 + $0xe0] sm:$0xff]  ;;  %v396_v60 = vld [vmem:[#allocation3 + $0xf0] sm:$0xff]  ;;  %v2974_v61 = vpack.c.bf16 %v397_v55, %v393_v53  ;;  %v399_v62 = vld [vmem:[#allocation3 + $0x108] sm:$0xff] }
  0x22   :  { %290 = vmatprep.mubr.f32.mxu1 %v2843_v0  ;;  %2066 = vmatprep.subr.bf16.mxu0 %v2951_v42  ;;  %v403_v63 = vld [vmem:[#allocation3 + $0x128] sm:$0xff]  ;;  %v41_v1 = vld [vmem:[%s3447_s0 + $0x18] sm:$0xff]  ;;  %v2981_v2 = vpack.c.bf16 %v394_v57, %v390_v56  ;;  %v2985_v5 = vpack.c.bf16 %v396_v60, %v392_v59  ;;  %v398_v6 = vld [vmem:[#allocation3 + $0x100] sm:$0xff] }
  0x23   :  { %1958 = vmatmul.mubr.msk.f32.gmra.mrb[4].mxu0 %vm76_vm0, %v40_v46  ;;  %2098 = vmatprep.subr.bf16.mxu1 %v2958_v47  ;;  %v401_v3 = vld [vmem:[#allocation3 + $0x118] sm:$0xff]  ;;  %v402_v7 = vld [vmem:[#allocation3 + $0x120] sm:$0xff]  ;;  %v2989_v8 = vpack.c.bf16 %v403_v63, %v399_v62  ;;  %v400_v9 = vld [vmem:[#allocation3 + $0x110] sm:$0xff] }
  0x24   :  { %1966 = vmatmul.mubr.msk.f32.gmra.mrb[4].mxu1 %vm76_vm0, %v40_v46  ;;  %2068 = vmatpush1.bf16.msra.mxu0 %v2962_v50  ;;  %v405_v4 = vld [vmem:[#allocation3 + $0x138] sm:$0xff]  ;;  %v404_v10 = vld [vmem:[#allocation3 + $0x130] sm:$0xff]  ;;  %v407_v12 = vld [vmem:[#allocation3 + $0x148] sm:$0xff]  ;;  %v3000_v15 = vpack.c.bf16 %v402_v7, %v398_v6  ;;  %v56_v7 = vlaneseq }
  0x25   :  { %2100 = vmatpush1.bf16.msra.mxu1 %v2966_v54  ;;  %183 = vmatprep.mubr.f32.mxu0 %v2843_v0  ;;  %v2993_v11 = vpack.c.bf16 %v405_v4, %v401_v3  ;;  %v411_v13 = vld [vmem:[#allocation3 + $0x168] sm:$0xff]  ;;  %v42_v14 = vld [vmem:[%s3447_s0 + $0x20] sm:$0xff]  ;;  %v409_v16 = vld [vmem:[#allocation3 + $0x158] sm:$0xff]  ;;  %v3004_v19 = vpack.c.bf16 %v404_v10, %v400_v9 }
  0x26   :  { %296 = vmatprep.mubr.f32.mxu1 %v2843_v0  ;;  %2070 = vmatprep.subr.bf16.mxu0 %v2970_v58  ;;  %v413_v18 = vld [vmem:[#allocation3 + $0x178] sm:$0xff]  ;;  %v406_v20 = vld [vmem:[#allocation3 + $0x140] sm:$0xff]  ;;  %v3008_v24 = vpack.c.bf16 %v411_v13, %v407_v12  ;;  %v408_v26 = vld [vmem:[#allocation3 + $0x150] sm:$0xff]  ;;  %v57_v9 = vshrl.u32 %v56_v7, 7 }
  0x27   :  { %1959 = vmatmul.mubr.msk.f32.gmra.mrb[6].mxu0 %vm76_vm0, %v41_v1  ;;  %2102 = vmatprep.subr.bf16.mxu1 %v2974_v61  ;;  %v410_v23 = vld [vmem:[#allocation3 + $0x160] sm:$0xff]  ;;  %v412_v27 = vld [vmem:[#allocation3 + $0x170] sm:$0xff]  ;;  %v3012_v28 = vpack.c.bf16 %v413_v18, %v409_v16  ;;  %v415_v30 = vld [vmem:[#allocation3 + $0x188] sm:$0xff] }
  0x28   :  { %1967 = vmatmul.mubr.msk.f32.gmra.mrb[6].mxu1 %vm76_vm0, %v41_v1  ;;  %2072 = vmatpush1.bf16.msra.mxu0 %v2981_v2  ;;  %v419_v31 = vld [vmem:[#allocation3 + $0x1a8] sm:$0xff]  ;;  %v3019_v33 = vpack.c.bf16 %v410_v23, %v406_v20  ;;  %v417_v36 = vld [vmem:[#allocation3 + $0x198] sm:$0xff]  ;;  %v3023_v39 = vpack.c.bf16 %v412_v27, %v408_v26  ;;  %v414_v40 = vld [vmem:[#allocation3 + $0x180] sm:$0xff]  ;;  %v58_v10 = vsub.s32 0, %v57_v9  ;;  %v62_v13 = vsub.s32 1, %v57_v9 }
  0x29   :  { %2104 = vmatpush1.bf16.msra.mxu1 %v2985_v5  ;;  %189 = vmatprep.mubr.f32.mxu0 %v2843_v0  ;;  %v43_v32 = vld [vmem:[%s3447_s0 + $0x28] sm:$0xff]  ;;  %v421_v37 = vld [vmem:[#allocation3 + $0x1b8] sm:$0xff]  ;;  %v418_v41 = vld [vmem:[#allocation3 + $0x1a0] sm:$0xff]  ;;  %v3027_v43 = vpack.c.bf16 %v419_v31, %v415_v30  ;;  %v70_v20 = vsub.s32 3, %v57_v9 }
  0x2a   :  { %302 = vmatprep.mubr.f32.mxu1 %v2843_v0  ;;  %2074 = vmatprep.subr.bf16.mxu0 %v2989_v8  ;;  %v416_v44 = vld [vmem:[#allocation3 + $0x190] sm:$0xff]  ;;  %v3031_v46 = vpack.c.bf16 %v421_v37, %v417_v36  ;;  %v423_v48 = vld [vmem:[#allocation3 + $0x1c8] sm:$0xff]  ;;  %v3038_v52 = vpack.c.bf16 %v418_v41, %v414_v40  ;;  %v425_v53 = vld [vmem:[#allocation3 + $0x1d8] sm:$0xff]  ;;  %v66_v40 = vsub.s32 2, %v57_v9 }
  0x2b   :  { %1960 = vmatmul.mubr.msk.f32.gmra.mrb[8].mxu0 %vm76_vm0, %v42_v14  ;;  %2106 = vmatprep.subr.bf16.mxu1 %v2993_v11  ;;  %v420_v45 = vld [vmem:[#allocation3 + $0x1b0] sm:$0xff]  ;;  %v427_v49 = vld [vmem:[#allocation3 + $0x1e8] sm:$0xff]  ;;  %v429_v55 = vld [vmem:[#allocation3 + $0x1f8] sm:$0xff] }
  0x2c   :  { %1968 = vmatmul.mubr.msk.f32.gmra.mrb[8].mxu1 %vm76_vm0, %v42_v14  ;;  %2076 = vmatpush1.bf16.msra.mxu0 %v3000_v15  ;;  %v44_v51 = vld [vmem:[%s3447_s0 + $0x30] sm:$0xff]  ;;  %v3042_v56 = vpack.c.bf16 %v420_v45, %v416_v44  ;;  %v422_v57 = vld [vmem:[#allocation3 + $0x1c0] sm:$0xff]  ;;  %v3046_v60 = vpack.c.bf16 %v427_v49, %v423_v48  ;;  %v3050_v1 = vpack.c.bf16 %v429_v55, %v425_v53  ;;  %v45_v3 = vld [vmem:[%s3447_s0 + $0x38] sm:$0xff] }
  0x2d   :  { %2108 = vmatpush1.bf16.msra.mxu1 %v3004_v19  ;;  %195 = vmatprep.mubr.f32.mxu0 %v2843_v0  ;;  %v426_v59 = vld [vmem:[#allocation3 + $0x1e0] sm:$0xff]  ;;  %v424_v62 = vld [vmem:[#allocation3 + $0x1d0] sm:$0xff] }
  0x2e   :  { %308 = vmatprep.mubr.f32.mxu1 %v2843_v0  ;;  %2078 = vmatprep.subr.bf16.mxu0 %v3008_v24  ;;  %v428_v63 = vld [vmem:[#allocation3 + $0x1f0] sm:$0xff]  ;;  %v3057_v4 = vpack.c.bf16 %v426_v59, %v422_v57  ;;  %v54_v12 = vld [vmem:[%s3450_s3] sm:$0xf] }
  0x2f   :  { %1961 = vmatmul.mubr.msk.f32.gmra.mrb[10].mxu0 %vm76_vm0, %v43_v32  ;;  %2110 = vmatprep.subr.bf16.mxu1 %v3012_v28  ;;  %v3061_v6 = vpack.c.bf16 %v428_v63, %v424_v62  ;;  %v3113_v14 = vrot.slane %v54_v12, %v58_v10  ;;  %v3115_v16 = vrot.slane %v54_v12, %v62_v13 }
  0x30   :  { %1969 = vmatmul.mubr.msk.f32.gmra.mrb[10].mxu1 %vm76_vm0, %v43_v32  ;;  %2080 = vmatpush1.bf16.msra.mxu0 %v3019_v33  ;;  %v3119_v37 = vrot.slane %v54_v12, %v70_v20  ;;  %v3122_v44 = vrot.slane %v54_v12, %v66_v40 }
  0x31   :  { %2112 = vmatpush1.bf16.msra.mxu1 %v3023_v39  ;;  %201 = vmatprep.mubr.f32.mxu0 %v2843_v0 }
  0x32   :  { %314 = vmatprep.mubr.f32.mxu1 %v2843_v0  ;;  %2082 = vmatprep.subr.bf16.mxu0 %v3027_v43 }
  0x33   :  { %1962 = vmatmul.mubr.msk.f32.gmra.mrb[12].mxu0 %vm76_vm0, %v44_v51  ;;  %2114 = vmatprep.subr.bf16.mxu1 %v3031_v46 }
  0x34   :  { %1970 = vmatmul.mubr.msk.f32.gmra.mrb[12].mxu1 %vm76_vm0, %v44_v51  ;;  %2084 = vmatpush1.bf16.msra.mxu0 %v3038_v52 }
  0x35   :  { %2116 = vmatpush1.bf16.msra.mxu1 %v3042_v56  ;;  %207 = vmatprep.mubr.f32.mxu0 %v2843_v0 }
  0x36   :  { %320 = vmatprep.mubr.f32.mxu1 %v2843_v0  ;;  %2086 = vmatprep.subr.bf16.mxu0 %v3046_v60 }
  0x37   :  { %1963 = vmatmul.mubr.msk.f32.gmra.mrb[14].mxu0 %vm76_vm0, %v45_v3  ;;  %2118 = vmatprep.subr.bf16.mxu1 %v3050_v1 }
  0x38   :  { %1971 = vmatmul.mubr.msk.f32.gmra.mrb[14].mxu1 %vm76_vm0, %v45_v3  ;;  %2088 = vmatpush1.bf16.msra.mxu0 %v3057_v4 }
  0x39   :  { %2120 = vmatpush1.bf16.msra.mxu1 %v3061_v6  ;;  %494 = vmatprep.mubr.f32.mxu0 %v2843_v0 }
  0x3a   :  { %565 = vmatprep.mubr.f32.mxu1 %v2843_v0  ;;  %2122 = vmatprep.subr.bf16.mxu0 %v2923_v17 }
  0x3b   :  { %495 = vmatmul.mubr.f32.vlgmr.msra.gmra.mrb[0].mxu0 %v2843_v0  ;;  %2154 = vmatprep.subr.bf16.mxu1 %v2925_v21 }
  0x3c   :  { %566 = vmatmul.mubr.f32.vlgmr.msra.gmra.mrb[0].mxu1 %v2843_v0  ;;  %2124 = vmatpush1.bf16.msra.mxu0 %v2927_v22 }
  0x3d   :  { %2156 = vmatpush1.bf16.msra.mxu1 %v2930_v25  ;;  %2126 = vmatprep.subr.bf16.mxu0 %v2934_v29 }
  0x3e   :  { %2158 = vmatprep.subr.bf16.mxu1 %v2941_v34  ;;  %671 = vmatprep.mubr.f32.mxu0 %v2843_v0 }
  0x3f   :  { %742 = vmatprep.mubr.f32.mxu1 %v2843_v0 }
  0x40   :  { %2128 = vmatpush1.bf16.msra.mxu0 %v2943_v35 }
  0x41   :  { %2160 = vmatpush1.bf16.msra.mxu1 %v2947_v38  ;;  %2130 = vmatprep.subr.bf16.mxu0 %v2951_v42 }
  0x42   :  { %2162 = vmatprep.subr.bf16.mxu1 %v2958_v47 }
  0x44   :  { %2132 = vmatpush1.bf16.msra.mxu0 %v2962_v50 }
  0x45   :  { %2164 = vmatpush1.bf16.msra.mxu1 %v2966_v54  ;;  %2134 = vmatprep.subr.bf16.mxu0 %v2970_v58 }
  0x46   :  { %2166 = vmatprep.subr.bf16.mxu1 %v2974_v61 }
  0x48   :  { %2136 = vmatpush1.bf16.msra.mxu0 %v2981_v2 }
  0x49   :  { %2168 = vmatpush1.bf16.msra.mxu1 %v2985_v5  ;;  %2138 = vmatprep.subr.bf16.mxu0 %v2989_v8 }
  0x4a   :  { %2170 = vmatprep.subr.bf16.mxu1 %v2993_v11 }
  0x4c   :  { %2140 = vmatpush1.bf16.msra.mxu0 %v3000_v15 }
  0x4d   :  { %2172 = vmatpush1.bf16.msra.mxu1 %v3004_v19  ;;  %2142 = vmatprep.subr.bf16.mxu0 %v3008_v24 }
  0x4e   :  { %2174 = vmatprep.subr.bf16.mxu1 %v3012_v28 }
  0x50   :  { %2144 = vmatpush1.bf16.msra.mxu0 %v3019_v33 }
  0x51   :  { %2176 = vmatpush1.bf16.msra.mxu1 %v3023_v39  ;;  %2146 = vmatprep.subr.bf16.mxu0 %v3027_v43 }
  0x52   :  { %2178 = vmatprep.subr.bf16.mxu1 %v3031_v46 }
  0x54   :  { %2148 = vmatpush1.bf16.msra.mxu0 %v3038_v52 }
  0x55   :  { %2180 = vmatpush1.bf16.msra.mxu1 %v3042_v56  ;;  %2150 = vmatprep.subr.bf16.mxu0 %v3046_v60 }
  0x56   :  { %2182 = vmatprep.subr.bf16.mxu1 %v3050_v1 }
  0x58   :  { %2152 = vmatpush1.bf16.msra.mxu0 %v3057_v4 }
  0x59   :  { %2184 = vmatpush1.bf16.msra.mxu1 %v3061_v6  ;;  %2186 = vmatprep.subr.bf16.mxu0 %v2923_v17 }
  0x5a   :  { %2218 = vmatprep.subr.bf16.mxu1 %v2925_v21 }
 0x10e   :  { %v496_v18 = vpop.f32.mrb[0].mxu0 }
 0x10f   :  { %v2593_v23 = vadd.f32 %v496_v18, %v3113_v14  ;;  %v567_v26 = vpop.f32.mrb[0].mxu1  ;;  %v498_v27 = vpop.f32.mrb[1].mxu0 }
 0x110   :  { %v2594_v30 = vadd.f32 %v498_v27, %v3115_v16  ;;  %v569_v31 = vpop.f32.mrb[1].mxu1  ;;  %v2609_v48 = vadd.f32 %v567_v26, %v3122_v44 }
 0x111   :  { %v1972_v32 = vmul.f32 -1.442695, %v2593_v23  ;;  %v2610_v41 = vadd.f32 %v569_v31, %v3119_v37 }
 0x112   :  { %v1973_v36 = vmul.f32 -1.442695, %v2594_v30 }
 0x113   :  { %2664 = vpow2.f32 %v1972_v32  ;;  %v1974_v45 = vmul.f32 -1.442695, %v2610_v41 }
 0x114   :  { %2666 = vpow2.f32 %v1973_v36 }
 0x115   :  { %2668 = vpow2.f32 %v1974_v45 }
 0x116   :  { %2670 = vtanh.f32 %v2609_v48 }
 0x11d   :  { %v2665_v49 = vpop.eup %2664 }
 0x11e   :  { %v2667_v51 = vpop.eup %2666  ;;  %v579_v53 = vadd.f32 1.0, %v2665_v49 }
 0x11f   :  { %v585_v55 = vadd.f32 1.0, %v2667_v51  ;;  %v2669_v57 = vpop.eup %2668 }
 0x120   :  { %2672 = vrcp.f32 %v579_v53  ;;  %v2671_v59 = vpop.eup %2670  ;;  %v592_v7 = vadd.f32 1.0, %v2669_v57 }
 0x121   :  { %2674 = vrcp.f32 %v585_v55 }
 0x122   :  { %2676 = vrcp.f32 %v592_v7 }
 0x12a   :  { %v2673_v62 = vpop.eup %2672 }
 0x12b   :  { %v2675_v63 = vpop.eup %2674  ;;  %v596_v3 = vmul.f32 %v2673_v62, %v2671_v59 }
 0x12c   :  { %v595_v9 = vmul.f32 0.0, %v2675_v63  ;;  %v2677_v12 = vpop.eup %2676 }
 0x12e   :  { %v3125_v10 = vadd.f32 %v596_v3, %v595_v9 }
 0x130   :  { %2678 = vtanh.f32 %v3125_v10 }
 0x13a   :  { %v2679_v13 = vpop.eup %2678 }
 0x13b   :  { %v599_v18 = vmul.f32 %v2679_v13, %v2677_v12 }
 0x13d   :  { %672 = vmatmul.mubr.f32.vlgmr.msra.gmra.mrb[2].mxu0 %v599_v18  ;;  %743 = vmatmul.mubr.f32.vlgmr.msra.gmra.mrb[2].mxu1 %v599_v18 }
 0x13e   :  { %2188 = vmatpush1.bf16.msra.mxu0 %v2927_v22  ;;  %2220 = vmatpush1.bf16.msra.mxu1 %v2930_v25 }
 0x13f   :  { %2190 = vmatprep.subr.bf16.mxu0 %v2934_v29  ;;  %2222 = vmatprep.subr.bf16.mxu1 %v2941_v34 }
 0x140   :  { %848 = vmatprep.mubr.f32.mxu0 %v2843_v0  ;;  %919 = vmatprep.mubr.f32.mxu1 %v2843_v0 }
 0x142   :  { %2192 = vmatpush1.bf16.msra.mxu0 %v2943_v35  ;;  %2224 = vmatpush1.bf16.msra.mxu1 %v2947_v38 }
 0x143   :  { %2194 = vmatprep.subr.bf16.mxu0 %v2951_v42  ;;  %2226 = vmatprep.subr.bf16.mxu1 %v2958_v47 }
 0x146   :  { %2196 = vmatpush1.bf16.msra.mxu0 %v2962_v50  ;;  %2228 = vmatpush1.bf16.msra.mxu1 %v2966_v54 }
 0x147   :  { %2198 = vmatprep.subr.bf16.mxu0 %v2970_v58  ;;  %2230 = vmatprep.subr.bf16.mxu1 %v2974_v61 }
 0x14a   :  { %2200 = vmatpush1.bf16.msra.mxu0 %v2981_v2  ;;  %2232 = vmatpush1.bf16.msra.mxu1 %v2985_v5 }
 0x14b   :  { %2202 = vmatprep.subr.bf16.mxu0 %v2989_v8  ;;  %2234 = vmatprep.subr.bf16.mxu1 %v2993_v11 }
 0x14e   :  { %2204 = vmatpush1.bf16.msra.mxu0 %v3000_v15  ;;  %2236 = vmatpush1.bf16.msra.mxu1 %v3004_v19 }
 0x14f   :  { %2206 = vmatprep.subr.bf16.mxu0 %v3008_v24  ;;  %2238 = vmatprep.subr.bf16.mxu1 %v3012_v28 }
 0x152   :  { %2208 = vmatpush1.bf16.msra.mxu0 %v3019_v33  ;;  %2240 = vmatpush1.bf16.msra.mxu1 %v3023_v39 }
 0x153   :  { %2210 = vmatprep.subr.bf16.mxu0 %v3027_v43  ;;  %2242 = vmatprep.subr.bf16.mxu1 %v3031_v46 }
 0x156   :  { %2212 = vmatpush1.bf16.msra.mxu0 %v3038_v52  ;;  %2244 = vmatpush1.bf16.msra.mxu1 %v3042_v56 }
 0x157   :  { %2214 = vmatprep.subr.bf16.mxu0 %v3046_v60  ;;  %2246 = vmatprep.subr.bf16.mxu1 %v3050_v1 }
 0x15a   :  { %2216 = vmatpush1.bf16.msra.mxu0 %v3057_v4  ;;  %2248 = vmatpush1.bf16.msra.mxu1 %v3061_v6 }
 0x15b   :  { %2250 = vmatprep.subr.bf16.mxu0 %v2923_v17  ;;  %2282 = vmatprep.subr.bf16.mxu1 %v2925_v21 }
 0x210   :  { %v673_v20 = vpop.f32.mrb[2].mxu0  ;;  %v744_v23 = vpop.f32.mrb[2].mxu1 }
 0x211   :  { %v2595_v26 = vadd.f32 %v673_v20, %v3113_v14  ;;  %v675_v27 = vpop.f32.mrb[3].mxu0  ;;  %v746_v30 = vpop.f32.mrb[3].mxu1  ;;  %v2611_v45 = vadd.f32 %v744_v23, %v3122_v44 }
 0x212   :  { %v2596_v31 = vadd.f32 %v675_v27, %v3115_v16  ;;  %v2612_v40 = vadd.f32 %v746_v30, %v3119_v37 }
 0x213   :  { %v1975_v32 = vmul.f32 -1.442695, %v2595_v26 }
 0x214   :  { %v1976_v36 = vmul.f32 -1.442695, %v2596_v31  ;;  %v1977_v41 = vmul.f32 -1.442695, %v2612_v40 }
 0x215   :  { %2680 = vpow2.f32 %v1975_v32 }
 0x216   :  { %2682 = vpow2.f32 %v1976_v36 }
 0x217   :  { %2684 = vpow2.f32 %v1977_v41 }
 0x218   :  { %2686 = vtanh.f32 %v2611_v45 }
 0x21f   :  { %v2681_v48 = vpop.eup %2680 }
 0x220   :  { %v2683_v49 = vpop.eup %2682  ;;  %v756_v51 = vadd.f32 1.0, %v2681_v48 }
 0x221   :  { %v762_v53 = vadd.f32 1.0, %v2683_v49  ;;  %v2685_v55 = vpop.eup %2684 }
 0x222   :  { %2688 = vrcp.f32 %v756_v51  ;;  %v2687_v57 = vpop.eup %2686  ;;  %v769_v3 = vadd.f32 1.0, %v2685_v55 }
 0x223   :  { %2690 = vrcp.f32 %v762_v53 }
 0x224   :  { %2692 = vrcp.f32 %v769_v3 }
 0x22c   :  { %v2689_v59 = vpop.eup %2688 }
 0x22d   :  { %v2691_v62 = vpop.eup %2690  ;;  %v773_v63 = vmul.f32 %v2689_v59, %v2687_v57 }
 0x22e   :  { %v772_v7 = vmul.f32 %v2691_v62, %v3125_v10  ;;  %v2693_v12 = vpop.eup %2692 }
 0x230   :  { %v3167_v9 = vadd.f32 %v773_v63, %v772_v7 }
 0x232   :  { %2694 = vtanh.f32 %v3167_v9 }
 0x23c   :  { %v2695_v13 = vpop.eup %2694 }
 0x23d   :  { %v776_v18 = vmul.f32 %v2695_v13, %v2693_v12 }
 0x23f   :  { %849 = vmatmul.mubr.f32.vlgmr.msra.gmra.mrb[4].mxu0 %v776_v18  ;;  %920 = vmatmul.mubr.f32.vlgmr.msra.gmra.mrb[4].mxu1 %v776_v18 }
 0x240   :  { %2252 = vmatpush1.bf16.msra.mxu0 %v2927_v22  ;;  %2284 = vmatpush1.bf16.msra.mxu1 %v2930_v25 }
 0x241   :  { %2254 = vmatprep.subr.bf16.mxu0 %v2934_v29  ;;  %2286 = vmatprep.subr.bf16.mxu1 %v2941_v34 }
 0x242   :  { %1025 = vmatprep.mubr.f32.mxu0 %v2843_v0  ;;  %1096 = vmatprep.mubr.f32.mxu1 %v2843_v0 }
 0x244   :  { %2256 = vmatpush1.bf16.msra.mxu0 %v2943_v35  ;;  %2288 = vmatpush1.bf16.msra.mxu1 %v2947_v38 }
 0x245   :  { %2258 = vmatprep.subr.bf16.mxu0 %v2951_v42  ;;  %2290 = vmatprep.subr.bf16.mxu1 %v2958_v47 }
 0x248   :  { %2260 = vmatpush1.bf16.msra.mxu0 %v2962_v50  ;;  %2292 = vmatpush1.bf16.msra.mxu1 %v2966_v54 }
 0x249   :  { %2262 = vmatprep.subr.bf16.mxu0 %v2970_v58  ;;  %2294 = vmatprep.subr.bf16.mxu1 %v2974_v61 }
 0x24c   :  { %2264 = vmatpush1.bf16.msra.mxu0 %v2981_v2  ;;  %2296 = vmatpush1.bf16.msra.mxu1 %v2985_v5 }
 0x24d   :  { %2266 = vmatprep.subr.bf16.mxu0 %v2989_v8  ;;  %2298 = vmatprep.subr.bf16.mxu1 %v2993_v11 }
 0x250   :  { %2268 = vmatpush1.bf16.msra.mxu0 %v3000_v15  ;;  %2300 = vmatpush1.bf16.msra.mxu1 %v3004_v19 }
 0x251   :  { %2270 = vmatprep.subr.bf16.mxu0 %v3008_v24  ;;  %2302 = vmatprep.subr.bf16.mxu1 %v3012_v28 }
 0x254   :  { %2272 = vmatpush1.bf16.msra.mxu0 %v3019_v33  ;;  %2304 = vmatpush1.bf16.msra.mxu1 %v3023_v39 }
 0x255   :  { %2274 = vmatprep.subr.bf16.mxu0 %v3027_v43  ;;  %2306 = vmatprep.subr.bf16.mxu1 %v3031_v46 }
 0x258   :  { %2276 = vmatpush1.bf16.msra.mxu0 %v3038_v52  ;;  %2308 = vmatpush1.bf16.msra.mxu1 %v3042_v56 }
 0x259   :  { %2278 = vmatprep.subr.bf16.mxu0 %v3046_v60  ;;  %2310 = vmatprep.subr.bf16.mxu1 %v3050_v1 }
 0x25c   :  { %2280 = vmatpush1.bf16.msra.mxu0 %v3057_v4  ;;  %2312 = vmatpush1.bf16.msra.mxu1 %v3061_v6 }
 0x25d   :  { %2314 = vmatprep.subr.bf16.mxu0 %v2923_v17  ;;  %2346 = vmatprep.subr.bf16.mxu1 %v2925_v21 }
 0x312   :  { %v850_v10 = vpop.f32.mrb[4].mxu0  ;;  %v921_v20 = vpop.f32.mrb[4].mxu1 }
 0x313   :  { %v2597_v23 = vadd.f32 %v850_v10, %v3113_v14  ;;  %v852_v26 = vpop.f32.mrb[5].mxu0  ;;  %v923_v27 = vpop.f32.mrb[5].mxu1  ;;  %v2613_v41 = vadd.f32 %v921_v20, %v3122_v44 }
 0x314   :  { %v2598_v30 = vadd.f32 %v852_v26, %v3115_v16  ;;  %v2614_v36 = vadd.f32 %v923_v27, %v3119_v37 }
 0x315   :  { %v1978_v31 = vmul.f32 -1.442695, %v2597_v23 }
 0x316   :  { %v1979_v32 = vmul.f32 -1.442695, %v2598_v30  ;;  %v1980_v40 = vmul.f32 -1.442695, %v2614_v36 }
 0x317   :  { %2696 = vpow2.f32 %v1978_v31 }
 0x318   :  { %2698 = vpow2.f32 %v1979_v32 }
 0x319   :  { %2700 = vpow2.f32 %v1980_v40 }
 0x31a   :  { %2702 = vtanh.f32 %v2613_v41 }
 0x321   :  { %v2697_v45 = vpop.eup %2696 }
 0x322   :  { %v2699_v48 = vpop.eup %2698  ;;  %v933_v49 = vadd.f32 1.0, %v2697_v45 }
 0x323   :  { %v939_v51 = vadd.f32 1.0, %v2699_v48  ;;  %v2701_v53 = vpop.eup %2700 }
 0x324   :  { %2704 = vrcp.f32 %v933_v49  ;;  %v2703_v55 = vpop.eup %2702  ;;  %v946_v63 = vadd.f32 1.0, %v2701_v53 }
 0x325   :  { %2706 = vrcp.f32 %v939_v51 }
 0x326   :  { %2708 = vrcp.f32 %v946_v63 }
 0x32e   :  { %v2705_v57 = vpop.eup %2704 }
 0x32f   :  { %v2707_v59 = vpop.eup %2706  ;;  %v950_v62 = vmul.f32 %v2705_v57, %v2703_v55 }
 0x330   :  { %v949_v3 = vmul.f32 %v2707_v59, %v3167_v9  ;;  %v2709_v12 = vpop.eup %2708 }
 0x332   :  { %v3209_v7 = vadd.f32 %v950_v62, %v949_v3 }
 0x334   :  { %2710 = vtanh.f32 %v3209_v7 }
 0x33e   :  { %v2711_v13 = vpop.eup %2710 }
 0x33f   :  { %v953_v18 = vmul.f32 %v2711_v13, %v2709_v12 }
 0x341   :  { %1026 = vmatmul.mubr.f32.vlgmr.msra.gmra.mrb[6].mxu0 %v953_v18  ;;  %1097 = vmatmul.mubr.f32.vlgmr.msra.gmra.mrb[6].mxu1 %v953_v18 }
 0x342   :  { %2316 = vmatpush1.bf16.msra.mxu0 %v2927_v22  ;;  %2348 = vmatpush1.bf16.msra.mxu1 %v2930_v25 }
 0x343   :  { %2318 = vmatprep.subr.bf16.mxu0 %v2934_v29  ;;  %2350 = vmatprep.subr.bf16.mxu1 %v2941_v34 }
 0x344   :  { %1202 = vmatprep.mubr.f32.mxu0 %v2843_v0  ;;  %1273 = vmatprep.mubr.f32.mxu1 %v2843_v0 }
 0x346   :  { %2320 = vmatpush1.bf16.msra.mxu0 %v2943_v35  ;;  %2352 = vmatpush1.bf16.msra.mxu1 %v2947_v38 }
 0x347   :  { %2322 = vmatprep.subr.bf16.mxu0 %v2951_v42  ;;  %2354 = vmatprep.subr.bf16.mxu1 %v2958_v47 }
 0x34a   :  { %2324 = vmatpush1.bf16.msra.mxu0 %v2962_v50  ;;  %2356 = vmatpush1.bf16.msra.mxu1 %v2966_v54 }
 0x34b   :  { %2326 = vmatprep.subr.bf16.mxu0 %v2970_v58  ;;  %2358 = vmatprep.subr.bf16.mxu1 %v2974_v61 }
 0x34e   :  { %2328 = vmatpush1.bf16.msra.mxu0 %v2981_v2  ;;  %2360 = vmatpush1.bf16.msra.mxu1 %v2985_v5 }
 0x34f   :  { %2330 = vmatprep.subr.bf16.mxu0 %v2989_v8  ;;  %2362 = vmatprep.subr.bf16.mxu1 %v2993_v11 }
 0x352   :  { %2332 = vmatpush1.bf16.msra.mxu0 %v3000_v15  ;;  %2364 = vmatpush1.bf16.msra.mxu1 %v3004_v19 }
 0x353   :  { %2334 = vmatprep.subr.bf16.mxu0 %v3008_v24  ;;  %2366 = vmatprep.subr.bf16.mxu1 %v3012_v28 }
 0x356   :  { %2336 = vmatpush1.bf16.msra.mxu0 %v3019_v33  ;;  %2368 = vmatpush1.bf16.msra.mxu1 %v3023_v39 }
 0x357   :  { %2338 = vmatprep.subr.bf16.mxu0 %v3027_v43  ;;  %2370 = vmatprep.subr.bf16.mxu1 %v3031_v46 }
 0x35a   :  { %2340 = vmatpush1.bf16.msra.mxu0 %v3038_v52  ;;  %2372 = vmatpush1.bf16.msra.mxu1 %v3042_v56 }
 0x35b   :  { %2342 = vmatprep.subr.bf16.mxu0 %v3046_v60  ;;  %2374 = vmatprep.subr.bf16.mxu1 %v3050_v1 }
 0x35e   :  { %2344 = vmatpush1.bf16.msra.mxu0 %v3057_v4  ;;  %2376 = vmatpush1.bf16.msra.mxu1 %v3061_v6 }
 0x35f   :  { %2378 = vmatprep.subr.bf16.mxu0 %v2923_v17  ;;  %2410 = vmatprep.subr.bf16.mxu1 %v2925_v21 }
 0x414   :  { %v1027_v9 = vpop.f32.mrb[6].mxu0  ;;  %v1098_v10 = vpop.f32.mrb[6].mxu1 }
 0x415   :  { %v2599_v20 = vadd.f32 %v1027_v9, %v3113_v14  ;;  %v1029_v23 = vpop.f32.mrb[7].mxu0  ;;  %v1100_v26 = vpop.f32.mrb[7].mxu1  ;;  %v2615_v40 = vadd.f32 %v1098_v10, %v3122_v44 }
 0x416   :  { %v2600_v27 = vadd.f32 %v1029_v23, %v3115_v16  ;;  %v2616_v32 = vadd.f32 %v1100_v26, %v3119_v37 }
 0x417   :  { %v1981_v30 = vmul.f32 -1.442695, %v2599_v20 }
 0x418   :  { %v1982_v31 = vmul.f32 -1.442695, %v2600_v27  ;;  %v1983_v36 = vmul.f32 -1.442695, %v2616_v32 }
 0x419   :  { %2712 = vpow2.f32 %v1981_v30 }
 0x41a   :  { %2714 = vpow2.f32 %v1982_v31 }
 0x41b   :  { %2716 = vpow2.f32 %v1983_v36 }
 0x41c   :  { %2718 = vtanh.f32 %v2615_v40 }
 0x423   :  { %v2713_v41 = vpop.eup %2712 }
 0x424   :  { %v2715_v45 = vpop.eup %2714  ;;  %v1110_v48 = vadd.f32 1.0, %v2713_v41 }
 0x425   :  { %v1116_v49 = vadd.f32 1.0, %v2715_v45  ;;  %v2717_v51 = vpop.eup %2716 }
 0x426   :  { %2720 = vrcp.f32 %v1110_v48  ;;  %v2719_v53 = vpop.eup %2718  ;;  %v1123_v62 = vadd.f32 1.0, %v2717_v51 }
 0x427   :  { %2722 = vrcp.f32 %v1116_v49 }
 0x428   :  { %2724 = vrcp.f32 %v1123_v62 }
 0x430   :  { %v2721_v55 = vpop.eup %2720 }
 0x431   :  { %v2723_v57 = vpop.eup %2722  ;;  %v1127_v59 = vmul.f32 %v2721_v55, %v2719_v53 }
 0x432   :  { %v1126_v63 = vmul.f32 %v2723_v57, %v3209_v7  ;;  %v2725_v12 = vpop.eup %2724 }
 0x434   :  { %v3251_v3 = vadd.f32 %v1127_v59, %v1126_v63 }
 0x436   :  { %2726 = vtanh.f32 %v3251_v3 }
 0x440   :  { %v2727_v13 = vpop.eup %2726 }
 0x441   :  { %v1130_v18 = vmul.f32 %v2727_v13, %v2725_v12 }
 0x443   :  { %1203 = vmatmul.mubr.f32.vlgmr.msra.gmra.mrb[8].mxu0 %v1130_v18  ;;  %1274 = vmatmul.mubr.f32.vlgmr.msra.gmra.mrb[8].mxu1 %v1130_v18 }
 0x444   :  { %2380 = vmatpush1.bf16.msra.mxu0 %v2927_v22  ;;  %2412 = vmatpush1.bf16.msra.mxu1 %v2930_v25 }
 0x445   :  { %2382 = vmatprep.subr.bf16.mxu0 %v2934_v29  ;;  %2414 = vmatprep.subr.bf16.mxu1 %v2941_v34 }
 0x446   :  { %1379 = vmatprep.mubr.f32.mxu0 %v2843_v0  ;;  %1450 = vmatprep.mubr.f32.mxu1 %v2843_v0 }
 0x448   :  { %2384 = vmatpush1.bf16.msra.mxu0 %v2943_v35  ;;  %2416 = vmatpush1.bf16.msra.mxu1 %v2947_v38 }
 0x449   :  { %2386 = vmatprep.subr.bf16.mxu0 %v2951_v42  ;;  %2418 = vmatprep.subr.bf16.mxu1 %v2958_v47 }
 0x44c   :  { %2388 = vmatpush1.bf16.msra.mxu0 %v2962_v50  ;;  %2420 = vmatpush1.bf16.msra.mxu1 %v2966_v54 }
 0x44d   :  { %2390 = vmatprep.subr.bf16.mxu0 %v2970_v58  ;;  %2422 = vmatprep.subr.bf16.mxu1 %v2974_v61 }
 0x450   :  { %2392 = vmatpush1.bf16.msra.mxu0 %v2981_v2  ;;  %2424 = vmatpush1.bf16.msra.mxu1 %v2985_v5 }
 0x451   :  { %2394 = vmatprep.subr.bf16.mxu0 %v2989_v8  ;;  %2426 = vmatprep.subr.bf16.mxu1 %v2993_v11 }
 0x454   :  { %2396 = vmatpush1.bf16.msra.mxu0 %v3000_v15  ;;  %2428 = vmatpush1.bf16.msra.mxu1 %v3004_v19 }
 0x455   :  { %2398 = vmatprep.subr.bf16.mxu0 %v3008_v24  ;;  %2430 = vmatprep.subr.bf16.mxu1 %v3012_v28 }
 0x458   :  { %2400 = vmatpush1.bf16.msra.mxu0 %v3019_v33  ;;  %2432 = vmatpush1.bf16.msra.mxu1 %v3023_v39 }
 0x459   :  { %2402 = vmatprep.subr.bf16.mxu0 %v3027_v43  ;;  %2434 = vmatprep.subr.bf16.mxu1 %v3031_v46 }
 0x45c   :  { %2404 = vmatpush1.bf16.msra.mxu0 %v3038_v52  ;;  %2436 = vmatpush1.bf16.msra.mxu1 %v3042_v56 }
 0x45d   :  { %2406 = vmatprep.subr.bf16.mxu0 %v3046_v60  ;;  %2438 = vmatprep.subr.bf16.mxu1 %v3050_v1 }
 0x460   :  { %2408 = vmatpush1.bf16.msra.mxu0 %v3057_v4  ;;  %2440 = vmatpush1.bf16.msra.mxu1 %v3061_v6 }
 0x461   :  { %2442 = vmatprep.subr.bf16.mxu0 %v2923_v17  ;;  %2474 = vmatprep.subr.bf16.mxu1 %v2925_v21 }
 0x516   :  { %v1204_v7 = vpop.f32.mrb[8].mxu0  ;;  %v1275_v9 = vpop.f32.mrb[8].mxu1 }
 0x517   :  { %v2601_v10 = vadd.f32 %v1204_v7, %v3113_v14  ;;  %v1206_v20 = vpop.f32.mrb[9].mxu0  ;;  %v1277_v23 = vpop.f32.mrb[9].mxu1  ;;  %v2617_v36 = vadd.f32 %v1275_v9, %v3122_v44 }
 0x518   :  { %v2602_v26 = vadd.f32 %v1206_v20, %v3115_v16  ;;  %v2618_v31 = vadd.f32 %v1277_v23, %v3119_v37 }
 0x519   :  { %v1984_v27 = vmul.f32 -1.442695, %v2601_v10 }
 0x51a   :  { %v1985_v30 = vmul.f32 -1.442695, %v2602_v26  ;;  %v1986_v32 = vmul.f32 -1.442695, %v2618_v31 }
 0x51b   :  { %2728 = vpow2.f32 %v1984_v27 }
 0x51c   :  { %2730 = vpow2.f32 %v1985_v30 }
 0x51d   :  { %2732 = vpow2.f32 %v1986_v32 }
 0x51e   :  { %2734 = vtanh.f32 %v2617_v36 }
 0x525   :  { %v2729_v40 = vpop.eup %2728 }
 0x526   :  { %v2731_v41 = vpop.eup %2730  ;;  %v1287_v45 = vadd.f32 1.0, %v2729_v40 }
 0x527   :  { %v1293_v48 = vadd.f32 1.0, %v2731_v41  ;;  %v2733_v49 = vpop.eup %2732 }
 0x528   :  { %2736 = vrcp.f32 %v1287_v45  ;;  %v2735_v51 = vpop.eup %2734  ;;  %v1300_v59 = vadd.f32 1.0, %v2733_v49 }
 0x529   :  { %2738 = vrcp.f32 %v1293_v48 }
 0x52a   :  { %2740 = vrcp.f32 %v1300_v59 }
 0x532   :  { %v2737_v53 = vpop.eup %2736 }
 0x533   :  { %v2739_v55 = vpop.eup %2738  ;;  %v1304_v57 = vmul.f32 %v2737_v53, %v2735_v51 }
 0x534   :  { %v1303_v62 = vmul.f32 %v2739_v55, %v3251_v3  ;;  %v2741_v12 = vpop.eup %2740 }
 0x536   :  { %v3293_v63 = vadd.f32 %v1304_v57, %v1303_v62 }
 0x538   :  { %2742 = vtanh.f32 %v3293_v63 }
 0x542   :  { %v2743_v13 = vpop.eup %2742 }
 0x543   :  { %v1307_v18 = vmul.f32 %v2743_v13, %v2741_v12  ;;  %v1842_v13 = vld [vmem:[%s3451_s4 + $0x18] sm:$0xff] }
 0x545   :  { %1380 = vmatmul.mubr.f32.vlgmr.msra.gmra.mrb[10].mxu0 %v1307_v18  ;;  %1451 = vmatmul.mubr.f32.vlgmr.msra.gmra.mrb[10].mxu1 %v1307_v18 }
 0x546   :  { %2444 = vmatpush1.bf16.msra.mxu0 %v2927_v22  ;;  %2476 = vmatpush1.bf16.msra.mxu1 %v2930_v25 }
 0x547   :  { %2446 = vmatprep.subr.bf16.mxu0 %v2934_v29  ;;  %2478 = vmatprep.subr.bf16.mxu1 %v2941_v34 }
 0x548   :  { %1556 = vmatprep.mubr.f32.mxu0 %v2843_v0  ;;  %1627 = vmatprep.mubr.f32.mxu1 %v2843_v0 }
 0x54a   :  { %2448 = vmatpush1.bf16.msra.mxu0 %v2943_v35  ;;  %2480 = vmatpush1.bf16.msra.mxu1 %v2947_v38 }
 0x54b   :  { %2450 = vmatprep.subr.bf16.mxu0 %v2951_v42  ;;  %2482 = vmatprep.subr.bf16.mxu1 %v2958_v47 }
 0x54e   :  { %2452 = vmatpush1.bf16.msra.mxu0 %v2962_v50  ;;  %2484 = vmatpush1.bf16.msra.mxu1 %v2966_v54 }
 0x54f   :  { %2454 = vmatprep.subr.bf16.mxu0 %v2970_v58  ;;  %2486 = vmatprep.subr.bf16.mxu1 %v2974_v61 }
 0x552   :  { %2456 = vmatpush1.bf16.msra.mxu0 %v2981_v2  ;;  %2488 = vmatpush1.bf16.msra.mxu1 %v2985_v5 }
 0x553   :  { %2458 = vmatprep.subr.bf16.mxu0 %v2989_v8  ;;  %2490 = vmatprep.subr.bf16.mxu1 %v2993_v11 }
 0x556   :  { %2460 = vmatpush1.bf16.msra.mxu0 %v3000_v15  ;;  %2492 = vmatpush1.bf16.msra.mxu1 %v3004_v19 }
 0x557   :  { %2462 = vmatprep.subr.bf16.mxu0 %v3008_v24  ;;  %2494 = vmatprep.subr.bf16.mxu1 %v3012_v28 }
 0x55a   :  { %2464 = vmatpush1.bf16.msra.mxu0 %v3019_v33  ;;  %2496 = vmatpush1.bf16.msra.mxu1 %v3023_v39 }
 0x55b   :  { %2466 = vmatprep.subr.bf16.mxu0 %v3027_v43  ;;  %2498 = vmatprep.subr.bf16.mxu1 %v3031_v46 }
 0x55e   :  { %2468 = vmatpush1.bf16.msra.mxu0 %v3038_v52  ;;  %2500 = vmatpush1.bf16.msra.mxu1 %v3042_v56 }
 0x55f   :  { %2470 = vmatprep.subr.bf16.mxu0 %v3046_v60  ;;  %2502 = vmatprep.subr.bf16.mxu1 %v3050_v1 }
 0x562   :  { %2472 = vmatpush1.bf16.msra.mxu0 %v3057_v4  ;;  %2504 = vmatpush1.bf16.msra.mxu1 %v3061_v6 }
 0x563   :  { %2506 = vmatprep.subr.bf16.mxu0 %v2923_v17  ;;  %2538 = vmatprep.subr.bf16.mxu1 %v2925_v21 }
 0x618   :  { %v1381_v3 = vpop.f32.mrb[10].mxu0  ;;  %v1452_v7 = vpop.f32.mrb[10].mxu1 }
 0x619   :  { %v2603_v9 = vadd.f32 %v1381_v3, %v3113_v14  ;;  %v1383_v10 = vpop.f32.mrb[11].mxu0  ;;  %v1454_v20 = vpop.f32.mrb[11].mxu1  ;;  %v2619_v32 = vadd.f32 %v1452_v7, %v3122_v44  ;;  %v1843_v3 = vld [vmem:[%s3451_s4 + $0x20] sm:$0xff]  ;;  %v1844_v7 = vld [vmem:[%s3451_s4 + $0x28] sm:$0xff] }
 0x61a   :  { %v2604_v23 = vadd.f32 %v1383_v10, %v3115_v16  ;;  %v2620_v30 = vadd.f32 %v1454_v20, %v3119_v37  ;;  %v1845_v10 = vld [vmem:[%s3451_s4 + $0x30] sm:$0xff]  ;;  %v1846_v20 = vld [vmem:[%s3451_s4 + $0x38] sm:$0xff] }
 0x61b   :  { %v1987_v26 = vmul.f32 -1.442695, %v2603_v9  ;;  %v2576_v9 = vpack.c.bf16 %v1844_v7, %v1843_v3 }
 0x61c   :  { %v1988_v27 = vmul.f32 -1.442695, %v2604_v23  ;;  %v1989_v31 = vmul.f32 -1.442695, %v2620_v30  ;;  %v2579_v23 = vpack.c.bf16 %v1846_v20, %v1845_v10 }
 0x61d   :  { %2744 = vpow2.f32 %v1987_v26  ;;  %v1847_v26 = vld [vmem:[%s3451_s4 + $0x40] sm:$0xff] }
 0x61e   :  { %2746 = vpow2.f32 %v1988_v27  ;;  %v1848_v27 = vld [vmem:[%s3451_s4 + $0x48] sm:$0xff] }
 0x61f   :  { %2748 = vpow2.f32 %v1989_v31  ;;  %v2582_v30 = vpack.c.bf16 %v1848_v27, %v1847_v26  ;;  %v1849_v31 = vld [vmem:[%s3451_s4 + $0x50] sm:$0xff] }
 0x620   :  { %2750 = vtanh.f32 %v2619_v32  ;;  %v1850_v32 = vld [vmem:[%s3451_s4 + $0x58] sm:$0xff] }
 0x627   :  { %v2745_v17 = vpop.eup %2744 }
 0x628   :  { %v2747_v36 = vpop.eup %2746  ;;  %v1464_v21 = vadd.f32 1.0, %v2745_v17  ;;  %v1851_v17 = vld [vmem:[%s3451_s4 + $0x60] sm:$0xff] }
 0x629   :  { %v1470_v40 = vadd.f32 1.0, %v2747_v36  ;;  %v2749_v41 = vpop.eup %2748  ;;  %v2585_v36 = vpack.c.bf16 %v1850_v32, %v1849_v31 }
 0x62a   :  { %2752 = vrcp.f32 %v1464_v21  ;;  %v2751_v45 = vpop.eup %2750  ;;  %v1477_v53 = vadd.f32 1.0, %v2749_v41  ;;  %v1852_v21 = vld [vmem:[%s3451_s4 + $0x68] sm:$0xff]  ;;  %v1853_v41 = vld [vmem:[%s3451_s4 + $0x70] sm:$0xff] }
 0x62b   :  { %2754 = vrcp.f32 %v1470_v40  ;;  %v2588_v40 = vpack.c.bf16 %v1852_v21, %v1851_v17 }
 0x62c   :  { %2756 = vrcp.f32 %v1477_v53 }
 0x634   :  { %v2753_v48 = vpop.eup %2752 }
 0x635   :  { %v2755_v49 = vpop.eup %2754  ;;  %v1481_v51 = vmul.f32 %v2753_v48, %v2751_v45  ;;  %v1854_v45 = vld [vmem:[%s3451_s4 + $0x78] sm:$0xff] }
 0x636   :  { %v1480_v55 = vmul.f32 %v2755_v49, %v3293_v63  ;;  %v2757_v59 = vpop.eup %2756  ;;  %v1841_v63 = vld [vmem:[%s3451_s4 + $0x10] sm:$0xff]  ;;  %v2591_v48 = vpack.c.bf16 %v1854_v45, %v1853_v41 }
 0x637   :  { %v2573_v18 = vpack.c.bf16 %v1842_v13, %v1841_v63 }
 0x638   :  { %v3335_v57 = vadd.f32 %v1481_v51, %v1480_v55 }
 0x63a   :  { %2758 = vtanh.f32 %v3335_v57 }
 0x644   :  { %v2759_v62 = vpop.eup %2758 }
 0x645   :  { %v1484_v12 = vmul.f32 %v2759_v62, %v2757_v59 }
 0x647   :  { %1557 = vmatmul.mubr.f32.vlgmr.msra.gmra.mrb[12].mxu0 %v1484_v12  ;;  %1628 = vmatmul.mubr.f32.vlgmr.msra.gmra.mrb[12].mxu1 %v1484_v12 }
 0x648   :  { %2508 = vmatpush1.bf16.msra.mxu0 %v2927_v22  ;;  %2540 = vmatpush1.bf16.msra.mxu1 %v2930_v25 }
 0x649   :  { %2510 = vmatprep.subr.bf16.mxu0 %v2934_v29  ;;  %2542 = vmatprep.subr.bf16.mxu1 %v2941_v34 }
 0x64a   :  { %1733 = vmatprep.mubr.f32.mxu0 %v2843_v0  ;;  %1804 = vmatprep.mubr.f32.mxu1 %v2843_v0 }
 0x64c   :  { %2512 = vmatpush1.bf16.msra.mxu0 %v2943_v35  ;;  %2544 = vmatpush1.bf16.msra.mxu1 %v2947_v38 }
 0x64d   :  { %2514 = vmatprep.subr.bf16.mxu0 %v2951_v42  ;;  %2546 = vmatprep.subr.bf16.mxu1 %v2958_v47 }
 0x650   :  { %2516 = vmatpush1.bf16.msra.mxu0 %v2962_v50  ;;  %2548 = vmatpush1.bf16.msra.mxu1 %v2966_v54 }
 0x651   :  { %2518 = vmatprep.subr.bf16.mxu0 %v2970_v58  ;;  %2550 = vmatprep.subr.bf16.mxu1 %v2974_v61 }
 0x654   :  { %2520 = vmatpush1.bf16.msra.mxu0 %v2981_v2  ;;  %2552 = vmatpush1.bf16.msra.mxu1 %v2985_v5 }
 0x655   :  { %2522 = vmatprep.subr.bf16.mxu0 %v2989_v8  ;;  %2554 = vmatprep.subr.bf16.mxu1 %v2993_v11 }
 0x658   :  { %2524 = vmatpush1.bf16.msra.mxu0 %v3000_v15  ;;  %2556 = vmatpush1.bf16.msra.mxu1 %v3004_v19 }
 0x659   :  { %2526 = vmatprep.subr.bf16.mxu0 %v3008_v24  ;;  %2558 = vmatprep.subr.bf16.mxu1 %v3012_v28 }
 0x65c   :  { %2528 = vmatpush1.bf16.msra.mxu0 %v3019_v33  ;;  %2560 = vmatpush1.bf16.msra.mxu1 %v3023_v39 }
 0x65d   :  { %2530 = vmatprep.subr.bf16.mxu0 %v3027_v43  ;;  %2562 = vmatprep.subr.bf16.mxu1 %v3031_v46 }
 0x660   :  { %2532 = vmatpush1.bf16.msra.mxu0 %v3038_v52  ;;  %2564 = vmatpush1.bf16.msra.mxu1 %v3042_v56 }
 0x661   :  { %2534 = vmatprep.subr.bf16.mxu0 %v3046_v60  ;;  %2566 = vmatprep.subr.bf16.mxu1 %v3050_v1  ;;  %v1839_v60 = vld [vmem:[%s3451_s4] sm:$0xff]  ;;  %v1840_v1 = vld [vmem:[%s3451_s4 + $0x8] sm:$0xff] }
 0x664   :  { %2536 = vmatpush1.bf16.msra.mxu0 %v3057_v4  ;;  %2568 = vmatpush1.bf16.msra.mxu1 %v3061_v6  ;;  %v2570_v4 = vpack.c.bf16 %v1840_v1, %v1839_v60  ;;  %v2844_v6 = vmov 0.0|0.0  }
 0x665   :  { %2569 = vmatprep.subr.bf16.mxu0 %v2844_v6 }
 0x71a   :  { %v1558_v22 = vpop.f32.mrb[12].mxu0  ;;  %v1629_v25 = vpop.f32.mrb[12].mxu1 }
 0x71b   :  { %v2605_v29 = vadd.f32 %v1558_v22, %v3113_v14  ;;  %v1560_v34 = vpop.f32.mrb[13].mxu0  ;;  %v1631_v35 = vpop.f32.mrb[13].mxu1  ;;  %v2621_v58 = vadd.f32 %v1629_v25, %v3122_v44 }
 0x71c   :  { %v2606_v38 = vadd.f32 %v1560_v34, %v3115_v16  ;;  %v2622_v50 = vadd.f32 %v1631_v35, %v3119_v37 }
 0x71d   :  { %v1990_v42 = vmul.f32 -1.442695, %v2605_v29 }
 0x71e   :  { %v1991_v47 = vmul.f32 -1.442695, %v2606_v38  ;;  %v1992_v54 = vmul.f32 -1.442695, %v2622_v50 }
 0x71f   :  { %2760 = vpow2.f32 %v1990_v42 }
 0x720   :  { %2762 = vpow2.f32 %v1991_v47 }
 0x721   :  { %2764 = vpow2.f32 %v1992_v54 }
 0x722   :  { %2766 = vtanh.f32 %v2621_v58 }
 0x729   :  { %v2761_v61 = vpop.eup %2760 }
 0x72a   :  { %v2763_v2 = vpop.eup %2762  ;;  %v1641_v5 = vadd.f32 1.0, %v2761_v61 }
 0x72b   :  { %v1647_v8 = vadd.f32 1.0, %v2763_v2  ;;  %v2765_v11 = vpop.eup %2764 }
 0x72c   :  { %2768 = vrcp.f32 %v1641_v5  ;;  %v2767_v15 = vpop.eup %2766  ;;  %v1654_v33 = vadd.f32 1.0, %v2765_v11  ;;  %v1996_v5 = vld [vmem:[%s3452_s5] ss:$0 sm:$0xff] }
 0x72d   :  { %2770 = vrcp.f32 %v1647_v8 }
 0x72e   :  { %2772 = vrcp.f32 %v1654_v33 }
 0x736   :  { %v2769_v19 = vpop.eup %2768 }
 0x737   :  { %v2771_v24 = vpop.eup %2770  ;;  %v1658_v28 = vmul.f32 %v2769_v19, %v2767_v15 }
 0x738   :  { %v1657_v39 = vmul.f32 %v2771_v24, %v3335_v57  ;;  %v2773_v46 = vpop.eup %2772 }
 0x73a   :  { %v3375_v43 = vadd.f32 %v1658_v28, %v1657_v39 }
 0x73c   :  { %2774 = vtanh.f32 %v3375_v43 }
 0x746   :  { %v2775_v52 = vpop.eup %2774 }
 0x747   :  { %v1661_v56 = vmul.f32 %v2775_v52, %v2773_v46 }
 0x749   :  { %1734 = vmatmul.mubr.f32.vlgmr.msra.gmra.mrb[14].mxu0 %v1661_v56  ;;  %1805 = vmatmul.mubr.f32.vlgmr.msra.gmra.mrb[14].mxu1 %v1661_v56 }
 0x74a   :  { %2571 = vmatpush3.bf16.msra.mxu0 %v2570_v4  ;;  %2046 = vmatprep.mubr.msk.f32.mxu0 %vm2845_vm1, %v2843_v0 }
 0x74b   :  { %2572 = vmatprep.subr.bf16.mxu0 %v2844_v6 }
 0x74e   :  { %2574 = vmatpush3.bf16.msra.mxu0 %v2573_v18 }
 0x74f   :  { %2575 = vmatprep.subr.bf16.mxu0 %v2844_v6 }
 0x752   :  { %2577 = vmatpush3.bf16.msra.mxu0 %v2576_v9 }
 0x753   :  { %2578 = vmatprep.subr.bf16.mxu0 %v2844_v6 }
 0x756   :  { %2580 = vmatpush3.bf16.msra.mxu0 %v2579_v23 }
 0x757   :  { %2581 = vmatprep.subr.bf16.mxu0 %v2844_v6 }
 0x75a   :  { %2583 = vmatpush3.bf16.msra.mxu0 %v2582_v30 }
 0x75b   :  { %2584 = vmatprep.subr.bf16.mxu0 %v2844_v6 }
 0x75e   :  { %2586 = vmatpush3.bf16.msra.mxu0 %v2585_v36 }
 0x75f   :  { %2587 = vmatprep.subr.bf16.mxu0 %v2844_v6 }
 0x762   :  { %2589 = vmatpush3.bf16.msra.mxu0 %v2588_v40 }
 0x763   :  { %2590 = vmatprep.subr.bf16.mxu0 %v2844_v6 }
 0x766   :  { %2592 = vmatpush3.bf16.msra.mxu0 %v2591_v48 }
 0x81c   :  { %v1735_v49 = vpop.f32.mrb[14].mxu0  ;;  %v1806_v51 = vpop.f32.mrb[14].mxu1 }
 0x81d   :  { %v2607_v53 = vadd.f32 %v1735_v49, %v3113_v14  ;;  %v1737_v0 = vpop.f32.mrb[15].mxu0  ;;  %v1808_v55 = vpop.f32.mrb[15].mxu1  ;;  %v2623_v25 = vadd.f32 %v1806_v51, %v3122_v44 }
 0x81e   :  { %v2608_v57 = vadd.f32 %v1737_v0, %v3115_v16  ;;  %v2624_v12 = vadd.f32 %v1808_v55, %v3119_v37 }
 0x81f   :  { %v1993_v59 = vmul.f32 -1.442695, %v2607_v53 }
 0x820   :  { %v1994_v62 = vmul.f32 -1.442695, %v2608_v57  ;;  %v1995_v22 = vmul.f32 -1.442695, %v2624_v12 }
 0x821   :  { %2776 = vpow2.f32 %v1993_v59 }
 0x822   :  { %2778 = vpow2.f32 %v1994_v62 }
 0x823   :  { %2780 = vpow2.f32 %v1995_v22 }
 0x824   :  { %2782 = vtanh.f32 %v2623_v25 }
 0x82b   :  { %v2777_v29 = vpop.eup %2776 }
 0x82c   :  { %v2779_v34 = vpop.eup %2778  ;;  %v1818_v35 = vadd.f32 1.0, %v2777_v29 }
 0x82d   :  { %v1824_v38 = vadd.f32 1.0, %v2779_v34  ;;  %v2781_v14 = vpop.eup %2780 }
 0x82e   :  { %2784 = vrcp.f32 %v1818_v35  ;;  %v2783_v42 = vpop.eup %2782  ;;  %v1831_v54 = vadd.f32 1.0, %v2781_v14 }
 0x82f   :  { %2786 = vrcp.f32 %v1824_v38 }
 0x830   :  { %2788 = vrcp.f32 %v1831_v54 }
 0x838   :  { %v2785_v16 = vpop.eup %2784 }
 0x839   :  { %v2787_v47 = vpop.eup %2786  ;;  %v1835_v50 = vmul.f32 %v2785_v16, %v2783_v42 }
 0x83a   :  { %v1834_v58 = vmul.f32 %v2787_v47, %v3375_v43  ;;  %v2789_v44 = vpop.eup %2788 }
 0x83c   :  { %v1836_v37 = vadd.f32 %v1835_v50, %v1834_v58 }
 0x83e   :  { %2790 = vtanh.f32 %v1836_v37 }
 0x848   :  { %v2791_v61 = vpop.eup %2790 }
 0x849   :  { %v1838_v2 = vmul.f32 %v2791_v61, %v2789_v44 }
 0x84b   :  { %2047 = vmatmul.mubr.f32.vlgmr.msra.gmra.mrb[16].mxu0 %v1838_v2 }
 0x91e   :  { %v1928_v8 = vpop.f32.mrb[16].mxu0 }
 0x91f   :  { %v1929_v11 = vadd.f32 %v1996_v5, %v1928_v8  ;;  %v2048_v15 = vpop.f32.mrb[17].mxu0 }
 0x921   :  { %1933 = vst.msk [vmem:[#allocation6] sm:$0xff] %vm1932_vm2, %v1929_v11 }
 0x922   :  { %2825 = shalt.err (!%p2822_p12)
}
 0x923   :  { %s2826_s26 = scalar_lea.hbm %s3453_s6, 128 }
 0x924   :  { %p2827_p13 = scmp.ne.s32.totalorder %s3453_s6, %s2826_s26  ;;  %p2830_p0 = scmp.lt.u32.totalorder %s2826_s26, %s3453_s6 }
 0x926   :  { %p2832_p1 = pnand %p2830_p0, %p2827_p13 }
 0x928   :  { %2835 = shalt.err (!%p2832_p1)
}
 0x929   :  { %1943 = dma.vmem_to_hbm [thread:$0]  %s1941_s22, 128, %s3453_s6, [#allocation5]  }
 0x92a   :  { %2838 = dma.done.wait [#allocation5], 128  }
 0x92b   :  { %2839 = vsyncadd [#allocation5], 4294967168 }
 0x92c   :  { %1947 = vsyncpa [#allocation4], 1 }
 0x92d   :  { %1948 = vsyncpa [#allocation5], 1 }

</bundles_post_ra>
